<compile_context>
chip_gen: v6e
topology: v6e:2x2x1
jax: 0.10.0
libtpu: 0.0.40
codegen_flags: <defaults>
</compile_context>

<pallas_src>
import jax
import jax.numpy as jnp
import numpy as np
from jax.experimental import pallas as pl
from jax.experimental.pallas import tpu as pltpu

PHYSICS_LS = 128
NLCFS = 129
# NIN = BM(38)+FF(38)+FT(1)+IA(19)+IP(1)+IU(38)+RB(1)
NIN = 38 + 38 + 1 + 19 + 1 + 38 + 1  # 136

MM_DTYPE = jnp.bfloat16  # MXU-native operand dtype on v5e / v6e / v7x


def _swish(x):
    # ActF: x * sigmoid(beta * x), beta initialized to 1.0.
    # exp and reciprocal both go to the EUP slot (idle here); f32 elementwise.
    # TODO(synk): learnable per-layer beta from trained checkpoints is not plumbed in.
    return x * pl.reciprocal(1.0 + jnp.exp(-x), approx=True)


def _dot(a, b):
    return jnp.dot(a, b, preferred_element_type=jnp.float32)


# ----------------------------- Kernel 1 --------------------------------------
# InputNet (norm folded into first Linear; 136->128->64->128 tanh) + LCFSHead
# (128->32->32->258).  Tiled over batch rows.  Weights bf16, biases f32.
def input_lcfs_kernel(x_ref,
                      w1, b1, w2, b2, w3, b3,          # InputNet (w1/b1 pre-folded)
                      lw1, lb1, lw2, lb2, lw3, lb3,    # LCFSHead
                      ph_out, lcfs_out):
    x = x_ref[...].astype(MM_DTYPE)
    h = _swish(_dot(x, w1[...]) + b1[...])
    h = _swish(_dot(h.astype(MM_DTYPE), w2[...]) + b2[...])
    ph = jnp.tanh(_dot(h.astype(MM_DTYPE), w3[...]) + b3[...])
    ph_out[...] = ph

    g = _swish(_dot(ph.astype(MM_DTYPE), lw1[...]) + lb1[...])
    g = _swish(_dot(g.astype(MM_DTYPE), lw2[...]) + lb2[...])
    lcfs_out[...] = _swish(_dot(g.astype(MM_DTYPE), lw3[...]) + lb3[...])


# ----------------------------- Kernel 2 --------------------------------------
# Points path, feature-major (point tile TN lives in the lane dimension):
#   PtsEncoder (2->16->128), psh^T = ps^T * ph (ph is a (128,1) column, lane
#   broadcast), fused iy/rt head -> (8, TN) lane-dense slab
#   (row 0 = iy, rows 1:4 = rt, rows 4:8 = zero pad).
def points_kernel(pts_ref, ph_ref,
                  pw1t, pb1t, pw2t, pb2t,              # PtsEncoder (transposed)
                  hw1t, hb1t, hw2t, hb2t,              # fused iy/rt head (transposed)
                  out_ref):
    pts = pts_ref[0]                                   # (2, TN)        f32
    ph = ph_ref[0]                                     # (PHYSICS_LS,1) f32
    w = pw1t[...]                                      # (16, 2)        f32
    # K=2 "matmul" as two VPU broadcast FMAs (no MXU push at ~1.5% utilization).
    s = _swish(w[:, 0:1] * pts[0:1, :] + w[:, 1:2] * pts[1:2, :] + pb1t[...])
    ps = _swish(_dot(pw2t[...], s.astype(MM_DTYPE)) + pb2t[...])        # (128, TN)
    psh = ps * ph                                      # aggregate_pts_ph (broadcast)
    h = _swish(_dot(hw1t[...], psh.astype(MM_DTYPE)) + hb1t[...])       # [hi; hr]
    out_ref[0] = _swish(_dot(hw2t[...], h.astype(MM_DTYPE)) + hb2t[...])  # (8, TN)


# -------------------------- One-time weight prep -------------------------------
def prepare_params(params, x_mean_std):
    """Hoisted out of the jitted forward: norm fold, head fusion, transposes,
    bf16 casts.  Call once; pass the result to fullnet_forward."""
    f32 = jnp.float32
    mean = jnp.asarray(x_mean_std[0], f32)
    std = jnp.asarray(x_mean_std[1], f32)
    std = jnp.where(jnp.abs(std) < 1e-8, 1.0, std)     # guard: zero std -> no scaling
    istd = 1.0 / std

    # Fold (x - mean)/std into the first Linear (in f32, BEFORE the bf16 cast).
    w1_raw, b1_raw = params['in1']
    w1 = w1_raw * istd[:, None]
    b1 = b1_raw - (mean * istd)[None, :] @ w1_raw

    def mm(w):                                         # matmul operand -> bf16
        return jnp.asarray(w, MM_DTYPE)

    k1 = [mm(w1), jnp.asarray(b1, f32)]
    for name in ('in2', 'in3', 'l1', 'l2', 'l3'):
        w, b = params[name]
        k1 += [mm(w), jnp.asarray(b, f32)]

    # --- points path: feature-major (transposed) weights --------------------
    pw1, pb1 = params['p1']                            # (2,16),   (1,16)
    pw2, pb2 = params['p2']                            # (16,128), (1,128)
    iw1, ib1 = params['iy1']                           # (128,64), (1,64)
    iw2, ib2 = params['iy2']                           # (64,1),   (1,1)
    rw1, rb1 = params['rt1']                           # (128,64), (1,64)
    rw2, rb2 = params['rt2']                           # (64,3),   (1,3)
    d_iy, d_rt = iw1.shape[1], rw1.shape[1]            # 64, 64

    pw1_t = jnp.asarray(pw1.T, f32)                    # (16, 2)  stays f32 (VPU path)
    pb1_t = jnp.asarray(pb1.T, f32)                    # (16, 1)
    pw2_t = mm(pw2.T)                                  # (128, 16)
    pb2_t = jnp.asarray(pb2.T, f32)                    # (128, 1)

    hw1_t = mm(jnp.concatenate([iw1, rw1], axis=1).T)  # (128,128): rows 0:64 hi, 64:128 hr
    hb1_t = jnp.asarray(jnp.concatenate([ib1, rb1], axis=1).T, f32)   # (128, 1)

    hw2_t = jnp.zeros((8, PHYSICS_LS), f32)
    hw2_t = hw2_t.at[0:1, 0:d_iy].set(iw2.T)           # iy second layer -> row 0
    hw2_t = hw2_t.at[1:4, d_iy:d_iy + d_rt].set(rw2.T) # rt second layer -> rows 1:4
    hw2_t = mm(hw2_t)                                  # (8, 128)
    hb2_t = jnp.zeros((8, 1), f32)
    hb2_t = hb2_t.at[0:1, :].set(ib2.T)
    hb2_t = hb2_t.at[1:4, :].set(rb2.T)

    k2 = [pw1_t, pb1_t, pw2_t, pb2_t, hw1_t, hb1_t, hw2_t, hb2_t]
    return {'k1': k1, 'k2': k2}


# ----------------------------- Wrapper ----------------------------------------
def fullnet_forward(x, pts, prep):
    B, NP = pts.shape[0], pts.shape[1]
    k1, k2 = prep['k1'], prep['k2']

    # ---------------- Kernel 1: batch-tiled InputNet + LCFSHead ----------------
    TB = B if B <= 1024 else 1024
    row1 = lambda i: (i, 0)
    cst1 = lambda i: (0, 0)
    ph, lcfs = pl.pallas_call(
        input_lcfs_kernel,
        out_shape=(jax.ShapeDtypeStruct((B, PHYSICS_LS), jnp.float32),
                   jax.ShapeDtypeStruct((B, 2 * NLCFS), jnp.float32)),
        grid=(pl.cdiv(B, TB),),
        in_specs=[pl.BlockSpec((TB, NIN), row1)]
                 + [pl.BlockSpec(w.shape, cst1) for w in k1],
        out_specs=(pl.BlockSpec((TB, PHYSICS_LS), row1),
                   pl.BlockSpec((TB, 2 * NLCFS), row1)),
        compiler_params=pltpu.CompilerParams(dimension_semantics=("parallel",)),
    )(x, *k1)

    # ---------------- Kernel 2: points path, feature-major, 2-D grid -----------
    TN = min(1024, ((NP + 127) // 128) * 128)          # adaptive lane tile
    NP_pad = ((NP + TN - 1) // TN) * TN
    pts_t = jnp.swapaxes(pts, 1, 2)                    # (B, 2, NP)
    if NP_pad != NP:
        pts_t = jnp.pad(pts_t, ((0, 0), (0, 0), (0, NP_pad - NP)))
    ph3 = ph[:, :, None]                               # (B, 128, 1) — no per-point repeat

    cst2 = lambda b, p: (0, 0)
    fused = pl.pallas_call(
        points_kernel,
        out_shape=jax.ShapeDtypeStruct((B, 8, NP_pad), jnp.float32),
        grid=(B, NP_pad // TN),
        in_specs=[pl.BlockSpec((1, 2, TN), lambda b, p: (b, 0, p)),
                  pl.BlockSpec((1, PHYSICS_LS, 1), lambda b, p: (b, 0, 0))]
                 + [pl.BlockSpec(w.shape, cst2) for w in k2],
        out_specs=pl.BlockSpec((1, 8, TN), lambda b, p: (b, 0, p)),
        compiler_params=pltpu.CompilerParams(
            dimension_semantics=("parallel", "parallel")),
    )(pts_t, ph3, *k2)

    iy = fused[:, 0, :NP]                              # (B, NP)     FHead(nout=1) squeeze
    rt = jnp.swapaxes(fused[:, 1:4, :NP], 1, 2)        # (B, NP, 3)
    return rt, iy, lcfs


# --------------------------- Reference (pure JAX, f32) --------------------------
def ref_forward(x, pts, params, x_mean_std):
    lin = lambda h, wb: h @ wb[0] + wb[1]
    sw = lambda v: v * jax.nn.sigmoid(v)
    xn = (x - x_mean_std[0]) / x_mean_std[1]
    h = sw(lin(xn, params['in1']))
    h = sw(lin(h, params['in2']))
    ph = jnp.tanh(lin(h, params['in3']))
    g = sw(lin(ph, params['l1']))
    g = sw(lin(g, params['l2']))
    lcfs = sw(lin(g, params['l3']))
    s = sw(lin(pts, params['p1']))
    ps = sw(lin(s, params['p2']))
    psh = ps * ph[:, None, :]
    iy = sw(lin(sw(lin(psh, params['iy1'])), params['iy2'])).squeeze(-1)
    rt = sw(lin(sw(lin(psh, params['rt1'])), params['rt2']))
    return rt, iy, lcfs


# ------------------------------ Params ------------------------------------------
def init_params(key):
    # PyTorch-style Linear init: U(-1/sqrt(fan_in), 1/sqrt(fan_in)).
    # Weights stored as (fan_in, fan_out); biases as (1, fan_out).
    def linear(k, fan_in, fan_out):
        k1, k2 = jax.random.split(k)
        lim = 1.0 / float(np.sqrt(fan_in))
        w = jax.random.uniform(k1, (fan_in, fan_out), jnp.float32, -lim, lim)
        b = jax.random.uniform(k2, (1, fan_out), jnp.float32, -lim, lim)
        return w, b

    ks = jax.random.split(key, 12)
    return {
        'in1': linear(ks[0], NIN, 128),
        'in2': linear(ks[1], 128, 64),
        'in3': linear(ks[2], 64, PHYSICS_LS),
        'l1':  linear(ks[3], PHYSICS_LS, 32),
        'l2':  linear(ks[4], 32, 32),
        'l3':  linear(ks[5], 32, NLCFS * 2),
        'p1':  linear(ks[6], 2, 16),
        'p2':  linear(ks[7], 16, PHYSICS_LS),
        'iy1': linear(ks[8], PHYSICS_LS, 64),
        'iy2': linear(ks[9], 64, 1),
        'rt1': linear(ks[10], PHYSICS_LS, 64),
        'rt2': linear(ks[11], 64, 3),
    }


if __name__ == "__main__":
    key = jax.random.PRNGKey(0)
    kx, kp, kw, km, ks = jax.random.split(key, 5)
    B, NP = 2, 8
    x = jax.random.normal(kx, (B, NIN), jnp.float32)
    pts = jax.random.normal(kp, (B, NP, 2), jnp.float32)
    params = init_params(kw)
    # non-trivial mean/std to exercise the folded normalization
    mean = 0.1 * jax.random.normal(km, (NIN,), jnp.float32)
    std = jax.random.uniform(ks, (NIN,), jnp.float32, 0.5, 1.5)
    x_mean_std = jnp.stack([mean, std])

    prep = prepare_params(params, x_mean_std)          # one-time, outside jit
    fwd = jax.jit(fullnet_forward)
    rt, iy, lcfs = jax.block_until_ready(fwd(x, pts, prep))

    assert rt.shape == (B, NP, 3)
    assert iy.shape == (B, NP)
    assert lcfs.shape == (B, 2 * NLCFS)

    rt_r, iy_r, lcfs_r = ref_forward(x, pts, params, x_mean_std)
    # bf16 matmul operands + approx EUP reciprocal -> looser tolerance than pure f32.
    tol = dict(atol=3e-2, rtol=3e-2)
    np.testing.assert_allclose(np.asarray(rt), np.asarray(rt_r), **tol)
    np.testing.assert_allclose(np.asarray(iy), np.asarray(iy_r), **tol)
    np.testing.assert_allclose(np.asarray(lcfs), np.asarray(lcfs_r), **tol)

    print("KERNEL_OK")
</pallas_src>

<mosaic_0001>
module attributes {stable_mosaic.version = 11 : i64} {
  func.func @input_lcfs_kernel(%arg0: i32, %arg1: memref<2x136xf32, #tpu.memory_space<vmem>>, %arg2: memref<136x128xbf16, #tpu.memory_space<vmem>>, %arg3: memref<1x128xf32, #tpu.memory_space<vmem>>, %arg4: memref<128x64xbf16, #tpu.memory_space<vmem>>, %arg5: memref<1x64xf32, #tpu.memory_space<vmem>>, %arg6: memref<64x128xbf16, #tpu.memory_space<vmem>>, %arg7: memref<1x128xf32, #tpu.memory_space<vmem>>, %arg8: memref<128x32xbf16, #tpu.memory_space<vmem>>, %arg9: memref<1x32xf32, #tpu.memory_space<vmem>>, %arg10: memref<32x32xbf16, #tpu.memory_space<vmem>>, %arg11: memref<1x32xf32, #tpu.memory_space<vmem>>, %arg12: memref<32x258xbf16, #tpu.memory_space<vmem>>, %arg13: memref<1x258xf32, #tpu.memory_space<vmem>>, %arg14: memref<2x128xf32, #tpu.memory_space<vmem>>, %arg15: memref<2x258xf32, #tpu.memory_space<vmem>>) attributes {dimension_semantics = [#tpu.dimension_semantics<parallel>], iteration_bounds = array<i64: 1>, scalar_prefetch = 0 : i64, scratch_operands = 0 : i64, tpu.core_type = #tpu.core_type<tc>, window_params = [{transform_indices = @transform_0, window_bounds = array<i64: 2, 136>}, {pipeline_mode = #tpu.pipeline_mode<synchronous>, transform_indices = @transform_1, window_bounds = array<i64: 136, 128>}, {pipeline_mode = #tpu.pipeline_mode<synchronous>, transform_indices = @transform_2, window_bounds = array<i64: 1, 128>}, {pipeline_mode = #tpu.pipeline_mode<synchronous>, transform_indices = @transform_3, window_bounds = array<i64: 128, 64>}, {pipeline_mode = #tpu.pipeline_mode<synchronous>, transform_indices = @transform_4, window_bounds = array<i64: 1, 64>}, {pipeline_mode = #tpu.pipeline_mode<synchronous>, transform_indices = @transform_5, window_bounds = array<i64: 64, 128>}, {pipeline_mode = #tpu.pipeline_mode<synchronous>, transform_indices = @transform_6, window_bounds = array<i64: 1, 128>}, {pipeline_mode = #tpu.pipeline_mode<synchronous>, transform_indices = @transform_7, window_bounds = array<i64: 128, 32>}, {pipeline_mode = #tpu.pipeline_mode<synchronous>, transform_indices = @transform_8, window_bounds = array<i64: 1, 32>}, {pipeline_mode = #tpu.pipeline_mode<synchronous>, transform_indices = @transform_9, window_bounds = array<i64: 32, 32>}, {pipeline_mode = #tpu.pipeline_mode<synchronous>, transform_indices = @transform_10, window_bounds = array<i64: 1, 32>}, {pipeline_mode = #tpu.pipeline_mode<synchronous>, transform_indices = @transform_11, window_bounds = array<i64: 32, 258>}, {pipeline_mode = #tpu.pipeline_mode<synchronous>, transform_indices = @transform_12, window_bounds = array<i64: 1, 258>}, {transform_indices = @transform_13, window_bounds = array<i64: 2, 128>}, {transform_indices = @transform_14, window_bounds = array<i64: 2, 258>}]} {
    %c0 = arith.constant 0 : index
    %c0_0 = arith.constant 0 : index
    %0 = vector.load %arg1[%c0, %c0_0] : memref<2x136xf32, #tpu.memory_space<vmem>>, vector<2x136xf32>
    %1 = arith.truncf %0 : vector<2x136xf32> to vector<2x136xbf16>
    %c0_1 = arith.constant 0 : index
    %c0_2 = arith.constant 0 : index
    %2 = vector.load %arg2[%c0_1, %c0_2] : memref<136x128xbf16, #tpu.memory_space<vmem>>, vector<136x128xbf16>
    %cst = arith.constant dense<0.000000e+00> : vector<2x128xf32>
    %3 = tpu.matmul %1, %2, %cst {dimension_numbers = #tpu.dot_dimension_numbers<[1], [0], [0], [1], [0, 0, 1, 1], [], []>} : vector<2x136xbf16>, vector<136x128xbf16>, vector<2x128xf32> -> vector<2x128xf32>
    %c0_3 = arith.constant 0 : index
    %c0_4 = arith.constant 0 : index
    %4 = vector.load %arg3[%c0_3, %c0_4] : memref<1x128xf32, #tpu.memory_space<vmem>>, vector<1x128xf32>
    %5 = vector.broadcast %4 : vector<1x128xf32> to vector<2x128xf32>
    %6 = arith.addf %3, %5 : vector<2x128xf32>
    %cst_5 = arith.constant 0.000000e+00 : f32
    %7 = vector.broadcast %cst_5 : f32 to vector<2x128xf32>
    %8 = arith.subf %7, %6 : vector<2x128xf32>
    %9 = math.exp %8 : vector<2x128xf32>
    %cst_6 = arith.constant 1.000000e+00 : f32
    %10 = vector.broadcast %cst_6 : f32 to vector<2x128xf32>
    %11 = arith.addf %10, %9 : vector<2x128xf32>
    %12 = tpu.reciprocal %11 {approx = true} : vector<2x128xf32> -> vector<2x128xf32>
    %13 = arith.mulf %6, %12 : vector<2x128xf32>
    %14 = arith.truncf %13 : vector<2x128xf32> to vector<2x128xbf16>
    %c0_7 = arith.constant 0 : index
    %c0_8 = arith.constant 0 : index
    %15 = vector.load %arg4[%c0_7, %c0_8] : memref<128x64xbf16, #tpu.memory_space<vmem>>, vector<128x64xbf16>
    %cst_9 = arith.constant dense<0.000000e+00> : vector<2x64xf32>
    %16 = tpu.matmul %14, %15, %cst_9 {dimension_numbers = #tpu.dot_dimension_numbers<[1], [0], [0], [1], [0, 0, 1, 1], [], []>} : vector<2x128xbf16>, vector<128x64xbf16>, vector<2x64xf32> -> vector<2x64xf32>
    %c0_10 = arith.constant 0 : index
    %c0_11 = arith.constant 0 : index
    %17 = vector.load %arg5[%c0_10, %c0_11] : memref<1x64xf32, #tpu.memory_space<vmem>>, vector<1x64xf32>
    %18 = vector.broadcast %17 : vector<1x64xf32> to vector<2x64xf32>
    %19 = arith.addf %16, %18 : vector<2x64xf32>
    %cst_12 = arith.constant 0.000000e+00 : f32
    %20 = vector.broadcast %cst_12 : f32 to vector<2x64xf32>
    %21 = arith.subf %20, %19 : vector<2x64xf32>
    %22 = math.exp %21 : vector<2x64xf32>
    %cst_13 = arith.constant 1.000000e+00 : f32
    %23 = vector.broadcast %cst_13 : f32 to vector<2x64xf32>
    %24 = arith.addf %23, %22 : vector<2x64xf32>
    %25 = tpu.reciprocal %24 {approx = true} : vector<2x64xf32> -> vector<2x64xf32>
    %26 = arith.mulf %19, %25 : vector<2x64xf32>
    %27 = arith.truncf %26 : vector<2x64xf32> to vector<2x64xbf16>
    %c0_14 = arith.constant 0 : index
    %c0_15 = arith.constant 0 : index
    %28 = vector.load %arg6[%c0_14, %c0_15] : memref<64x128xbf16, #tpu.memory_space<vmem>>, vector<64x128xbf16>
    %cst_16 = arith.constant dense<0.000000e+00> : vector<2x128xf32>
    %29 = tpu.matmul %27, %28, %cst_16 {dimension_numbers = #tpu.dot_dimension_numbers<[1], [0], [0], [1], [0, 0, 1, 1], [], []>} : vector<2x64xbf16>, vector<64x128xbf16>, vector<2x128xf32> -> vector<2x128xf32>
    %c0_17 = arith.constant 0 : index
    %c0_18 = arith.constant 0 : index
    %30 = vector.load %arg7[%c0_17, %c0_18] : memref<1x128xf32, #tpu.memory_space<vmem>>, vector<1x128xf32>
    %31 = vector.broadcast %30 : vector<1x128xf32> to vector<2x128xf32>
    %32 = arith.addf %29, %31 : vector<2x128xf32>
    %33 = math.tanh %32 : vector<2x128xf32>
    %c0_19 = arith.constant 0 : index
    %c0_20 = arith.constant 0 : index
    %34 = vector.load %arg14[%c0_19, %c0_20] : memref<2x128xf32, #tpu.memory_space<vmem>>, vector<2x128xf32>
    tpu.vector_store %arg14[%c0_19, %c0_20], %33 {strides = array<i32>} : memref<2x128xf32, #tpu.memory_space<vmem>>, vector<2x128xf32>,
    %35 = arith.truncf %33 : vector<2x128xf32> to vector<2x128xbf16>
    %c0_21 = arith.constant 0 : index
    %c0_22 = arith.constant 0 : index
    %36 = vector.load %arg8[%c0_21, %c0_22] : memref<128x32xbf16, #tpu.memory_space<vmem>>, vector<128x32xbf16>
    %cst_23 = arith.constant dense<0.000000e+00> : vector<2x32xf32>
    %37 = tpu.matmul %35, %36, %cst_23 {dimension_numbers = #tpu.dot_dimension_numbers<[1], [0], [0], [1], [0, 0, 1, 1], [], []>} : vector<2x128xbf16>, vector<128x32xbf16>, vector<2x32xf32> -> vector<2x32xf32>
    %c0_24 = arith.constant 0 : index
    %c0_25 = arith.constant 0 : index
    %38 = vector.load %arg9[%c0_24, %c0_25] : memref<1x32xf32, #tpu.memory_space<vmem>>, vector<1x32xf32>
    %39 = vector.broadcast %38 : vector<1x32xf32> to vector<2x32xf32>
    %40 = arith.addf %37, %39 : vector<2x32xf32>
    %cst_26 = arith.constant 0.000000e+00 : f32
    %41 = vector.broadcast %cst_26 : f32 to vector<2x32xf32>
    %42 = arith.subf %41, %40 : vector<2x32xf32>
    %43 = math.exp %42 : vector<2x32xf32>
    %cst_27 = arith.constant 1.000000e+00 : f32
    %44 = vector.broadcast %cst_27 : f32 to vector<2x32xf32>
    %45 = arith.addf %44, %43 : vector<2x32xf32>
    %46 = tpu.reciprocal %45 {approx = true} : vector<2x32xf32> -> vector<2x32xf32>
    %47 = arith.mulf %40, %46 : vector<2x32xf32>
    %48 = arith.truncf %47 : vector<2x32xf32> to vector<2x32xbf16>
    %c0_28 = arith.constant 0 : index
    %c0_29 = arith.constant 0 : index
    %49 = vector.load %arg10[%c0_28, %c0_29] : memref<32x32xbf16, #tpu.memory_space<vmem>>, vector<32x32xbf16>
    %cst_30 = arith.constant dense<0.000000e+00> : vector<2x32xf32>
    %50 = tpu.matmul %48, %49, %cst_30 {dimension_numbers = #tpu.dot_dimension_numbers<[1], [0], [0], [1], [0, 0, 1, 1], [], []>} : vector<2x32xbf16>, vector<32x32xbf16>, vector<2x32xf32> -> vector<2x32xf32>
    %c0_31 = arith.constant 0 : index
    %c0_32 = arith.constant 0 : index
    %51 = vector.load %arg11[%c0_31, %c0_32] : memref<1x32xf32, #tpu.memory_space<vmem>>, vector<1x32xf32>
    %52 = vector.broadcast %51 : vector<1x32xf32> to vector<2x32xf32>
    %53 = arith.addf %50, %52 : vector<2x32xf32>
    %cst_33 = arith.constant 0.000000e+00 : f32
    %54 = vector.broadcast %cst_33 : f32 to vector<2x32xf32>
    %55 = arith.subf %54, %53 : vector<2x32xf32>
    %56 = math.exp %55 : vector<2x32xf32>
    %cst_34 = arith.constant 1.000000e+00 : f32
    %57 = vector.broadcast %cst_34 : f32 to vector<2x32xf32>
    %58 = arith.addf %57, %56 : vector<2x32xf32>
    %59 = tpu.reciprocal %58 {approx = true} : vector<2x32xf32> -> vector<2x32xf32>
    %60 = arith.mulf %53, %59 : vector<2x32xf32>
    %61 = arith.truncf %60 : vector<2x32xf32> to vector<2x32xbf16>
    %c0_35 = arith.constant 0 : index
    %c0_36 = arith.constant 0 : index
    %62 = vector.load %arg12[%c0_35, %c0_36] : memref<32x258xbf16, #tpu.memory_space<vmem>>, vector<32x258xbf16>
    %cst_37 = arith.constant dense<0.000000e+00> : vector<2x258xf32>
    %63 = tpu.matmul %61, %62, %cst_37 {dimension_numbers = #tpu.dot_dimension_numbers<[1], [0], [0], [1], [0, 0, 1, 1], [], []>} : vector<2x32xbf16>, vector<32x258xbf16>, vector<2x258xf32> -> vector<2x258xf32>
    %c0_38 = arith.constant 0 : index
    %c0_39 = arith.constant 0 : index
    %64 = vector.load %arg13[%c0_38, %c0_39] : memref<1x258xf32, #tpu.memory_space<vmem>>, vector<1x258xf32>
    %65 = vector.broadcast %64 : vector<1x258xf32> to vector<2x258xf32>
    %66 = arith.addf %63, %65 : vector<2x258xf32>
    %cst_40 = arith.constant 0.000000e+00 : f32
    %67 = vector.broadcast %cst_40 : f32 to vector<2x258xf32>
    %68 = arith.subf %67, %66 : vector<2x258xf32>
    %69 = math.exp %68 : vector<2x258xf32>
    %cst_41 = arith.constant 1.000000e+00 : f32
    %70 = vector.broadcast %cst_41 : f32 to vector<2x258xf32>
    %71 = arith.addf %70, %69 : vector<2x258xf32>
    %72 = tpu.reciprocal %71 {approx = true} : vector<2x258xf32> -> vector<2x258xf32>
    %73 = arith.mulf %66, %72 : vector<2x258xf32>
    %c0_42 = arith.constant 0 : index
    %c0_43 = arith.constant 0 : index
    %74 = vector.load %arg15[%c0_42, %c0_43] : memref<2x258xf32, #tpu.memory_space<vmem>>, vector<2x258xf32>
    tpu.vector_store %arg15[%c0_42, %c0_43], %73 {strides = array<i32>} : memref<2x258xf32, #tpu.memory_space<vmem>>, vector<2x258xf32>,
    return
  }
  func.func @transform_0(%arg0: i32) -> (i32, i32) {
    %c0_i32 = arith.constant 0 : i32
    %c0_i32_0 = arith.constant 0 : i32
    return %arg0, %c0_i32 : i32, i32
  }
  func.func @transform_1(%arg0: i32) -> (i32, i32) {
    %c0_i32 = arith.constant 0 : i32
    %c0_i32_0 = arith.constant 0 : i32
    %c0_i32_1 = arith.constant 0 : i32
    return %c0_i32, %c0_i32_0 : i32, i32
  }
  func.func @transform_2(%arg0: i32) -> (i32, i32) {
    %c0_i32 = arith.constant 0 : i32
    %c0_i32_0 = arith.constant 0 : i32
    %c0_i32_1 = arith.constant 0 : i32
    return %c0_i32, %c0_i32_0 : i32, i32
  }
  func.func @transform_3(%arg0: i32) -> (i32, i32) {
    %c0_i32 = arith.constant 0 : i32
    %c0_i32_0 = arith.constant 0 : i32
    %c0_i32_1 = arith.constant 0 : i32
    return %c0_i32, %c0_i32_0 : i32, i32
  }
  func.func @transform_4(%arg0: i32) -> (i32, i32) {
    %c0_i32 = arith.constant 0 : i32
    %c0_i32_0 = arith.constant 0 : i32
    %c0_i32_1 = arith.constant 0 : i32
    return %c0_i32, %c0_i32_0 : i32, i32
  }
  func.func @transform_5(%arg0: i32) -> (i32, i32) {
    %c0_i32 = arith.constant 0 : i32
    %c0_i32_0 = arith.constant 0 : i32
    %c0_i32_1 = arith.constant 0 : i32
    return %c0_i32, %c0_i32_0 : i32, i32
  }
  func.func @transform_6(%arg0: i32) -> (i32, i32) {
    %c0_i32 = arith.constant 0 : i32
    %c0_i32_0 = arith.constant 0 : i32
    %c0_i32_1 = arith.constant 0 : i32
    return %c0_i32, %c0_i32_0 : i32, i32
  }
  func.func @transform_7(%arg0: i32) -> (i32, i32) {
    %c0_i32 = arith.constant 0 : i32
    %c0_i32_0 = arith.constant 0 : i32
    %c0_i32_1 = arith.constant 0 : i32
    return %c0_i32, %c0_i32_0 : i32, i32
  }
  func.func @transform_8(%arg0: i32) -> (i32, i32) {
    %c0_i32 = arith.constant 0 : i32
    %c0_i32_0 = arith.constant 0 : i32
    %c0_i32_1 = arith.constant 0 : i32
    return %c0_i32, %c0_i32_0 : i32, i32
  }
  func.func @transform_9(%arg0: i32) -> (i32, i32) {
    %c0_i32 = arith.constant 0 : i32
    %c0_i32_0 = arith.constant 0 : i32
    %c0_i32_1 = arith.constant 0 : i32
    return %c0_i32, %c0_i32_0 : i32, i32
  }
  func.func @transform_10(%arg0: i32) -> (i32, i32) {
    %c0_i32 = arith.constant 0 : i32
    %c0_i32_0 = arith.constant 0 : i32
    %c0_i32_1 = arith.constant 0 : i32
    return %c0_i32, %c0_i32_0 : i32, i32
  }
  func.func @transform_11(%arg0: i32) -> (i32, i32) {
    %c0_i32 = arith.constant 0 : i32
    %c0_i32_0 = arith.constant 0 : i32
    %c0_i32_1 = arith.constant 0 : i32
    return %c0_i32, %c0_i32_0 : i32, i32
  }
  func.func @transform_12(%arg0: i32) -> (i32, i32) {
    %c0_i32 = arith.constant 0 : i32
    %c0_i32_0 = arith.constant 0 : i32
    %c0_i32_1 = arith.constant 0 : i32
    return %c0_i32, %c0_i32_0 : i32, i32
  }
  func.func @transform_13(%arg0: i32) -> (i32, i32) {
    %c0_i32 = arith.constant 0 : i32
    %c0_i32_0 = arith.constant 0 : i32
    return %arg0, %c0_i32 : i32, i32
  }
  func.func @transform_14(%arg0: i32) -> (i32, i32) {
    %c0_i32 = arith.constant 0 : i32
    %c0_i32_0 = arith.constant 0 : i32
    return %arg0, %c0_i32 : i32, i32
  }
}

module attributes {stable_mosaic.version = 11 : i64} {
  func.func @points_kernel(%arg0: i32, %arg1: i32, %arg2: memref<1x2x128xf32, #tpu.memory_space<vmem>>, %arg3: memref<1x128x1xf32, #tpu.memory_space<vmem>>, %arg4: memref<16x2xf32, #tpu.memory_space<vmem>>, %arg5: memref<16x1xf32, #tpu.memory_space<vmem>>, %arg6: memref<128x16xbf16, #tpu.memory_space<vmem>>, %arg7: memref<128x1xf32, #tpu.memory_space<vmem>>, %arg8: memref<128x128xbf16, #tpu.memory_space<vmem>>, %arg9: memref<128x1xf32, #tpu.memory_space<vmem>>, %arg10: memref<8x128xbf16, #tpu.memory_space<vmem>>, %arg11: memref<8x1xf32, #tpu.memory_space<vmem>>, %arg12: memref<1x8x128xf32, #tpu.memory_space<vmem>>) attributes {dimension_semantics = [#tpu.dimension_semantics<parallel>, #tpu.dimension_semantics<parallel>], iteration_bounds = array<i64: 2, 1>, scalar_prefetch = 0 : i64, scratch_operands = 0 : i64, tpu.core_type = #tpu.core_type<tc>, window_params = [{transform_indices = @transform_0, window_bounds = array<i64: 1, 2, 128>}, {transform_indices = @transform_1, window_bounds = array<i64: 1, 128, 1>}, {pipeline_mode = #tpu.pipeline_mode<synchronous>, transform_indices = @transform_2, window_bounds = array<i64: 16, 2>}, {pipeline_mode = #tpu.pipeline_mode<synchronous>, transform_indices = @transform_3, window_bounds = array<i64: 16, 1>}, {pipeline_mode = #tpu.pipeline_mode<synchronous>, transform_indices = @transform_4, window_bounds = array<i64: 128, 16>}, {pipeline_mode = #tpu.pipeline_mode<synchronous>, transform_indices = @transform_5, window_bounds = array<i64: 128, 1>}, {pipeline_mode = #tpu.pipeline_mode<synchronous>, transform_indices = @transform_6, window_bounds = array<i64: 128, 128>}, {pipeline_mode = #tpu.pipeline_mode<synchronous>, transform_indices = @transform_7, window_bounds = array<i64: 128, 1>}, {pipeline_mode = #tpu.pipeline_mode<synchronous>, transform_indices = @transform_8, window_bounds = array<i64: 8, 128>}, {pipeline_mode = #tpu.pipeline_mode<synchronous>, transform_indices = @transform_9, window_bounds = array<i64: 8, 1>}, {transform_indices = @transform_10, window_bounds = array<i64: 1, 8, 128>}]} {
    %c0 = arith.constant 0 : index
    %c0_0 = arith.constant 0 : index
    %c0_1 = arith.constant 0 : index
    %0 = vector.load %arg2[%c0, %c0_0, %c0_1] : memref<1x2x128xf32, #tpu.memory_space<vmem>>, vector<1x2x128xf32>
    %1 = vector.shape_cast %0 : vector<1x2x128xf32> to vector<2x128xf32>
    %c0_2 = arith.constant 0 : index
    %c0_3 = arith.constant 0 : index
    %c0_4 = arith.constant 0 : index
    %2 = vector.load %arg3[%c0_2, %c0_3, %c0_4] : memref<1x128x1xf32, #tpu.memory_space<vmem>>, vector<1x128x1xf32>
    %3 = vector.shape_cast %2 : vector<1x128x1xf32> to vector<128x1xf32>
    %c0_5 = arith.constant 0 : index
    %c0_6 = arith.constant 0 : index
    %4 = vector.load %arg4[%c0_5, %c0_6] : memref<16x2xf32, #tpu.memory_space<vmem>>, vector<16x2xf32>
    %5 = vector.extract_strided_slice %4 {offsets = [0, 0], sizes = [16, 1], strides = [1, 1]} : vector<16x2xf32> to vector<16x1xf32>
    %6 = vector.extract_strided_slice %1 {offsets = [0, 0], sizes = [1, 128], strides = [1, 1]} : vector<2x128xf32> to vector<1x128xf32>
    %7 = vector.broadcast %5 : vector<16x1xf32> to vector<16x128xf32>
    %8 = vector.broadcast %6 : vector<1x128xf32> to vector<16x128xf32>
    %9 = arith.mulf %7, %8 : vector<16x128xf32>
    %10 = vector.extract_strided_slice %4 {offsets = [0, 1], sizes = [16, 1], strides = [1, 1]} : vector<16x2xf32> to vector<16x1xf32>
    %11 = vector.extract_strided_slice %1 {offsets = [1, 0], sizes = [1, 128], strides = [1, 1]} : vector<2x128xf32> to vector<1x128xf32>
    %12 = vector.broadcast %10 : vector<16x1xf32> to vector<16x128xf32>
    %13 = vector.broadcast %11 : vector<1x128xf32> to vector<16x128xf32>
    %14 = arith.mulf %12, %13 : vector<16x128xf32>
    %15 = arith.addf %9, %14 : vector<16x128xf32>
    %c0_7 = arith.constant 0 : index
    %c0_8 = arith.constant 0 : index
    %16 = vector.load %arg5[%c0_7, %c0_8] : memref<16x1xf32, #tpu.memory_space<vmem>>, vector<16x1xf32>
    %17 = vector.broadcast %16 : vector<16x1xf32> to vector<16x128xf32>
    %18 = arith.addf %15, %17 : vector<16x128xf32>
    %cst = arith.constant 0.000000e+00 : f32
    %19 = vector.broadcast %cst : f32 to vector<16x128xf32>
    %20 = arith.subf %19, %18 : vector<16x128xf32>
    %21 = math.exp %20 : vector<16x128xf32>
    %cst_9 = arith.constant 1.000000e+00 : f32
    %22 = vector.broadcast %cst_9 : f32 to vector<16x128xf32>
    %23 = arith.addf %22, %21 : vector<16x128xf32>
    %24 = tpu.reciprocal %23 {approx = true} : vector<16x128xf32> -> vector<16x128xf32>
    %25 = arith.mulf %18, %24 : vector<16x128xf32>
    %c0_10 = arith.constant 0 : index
    %c0_11 = arith.constant 0 : index
    %26 = vector.load %arg6[%c0_10, %c0_11] : memref<128x16xbf16, #tpu.memory_space<vmem>>, vector<128x16xbf16>
    %27 = arith.truncf %25 : vector<16x128xf32> to vector<16x128xbf16>
    %cst_12 = arith.constant dense<0.000000e+00> : vector<128x128xf32>
    %28 = tpu.matmul %26, %27, %cst_12 {dimension_numbers = #tpu.dot_dimension_numbers<[1], [0], [0], [1], [0, 0, 1, 1], [], []>} : vector<128x16xbf16>, vector<16x128xbf16>, vector<128x128xf32> -> vector<128x128xf32>
    %c0_13 = arith.constant 0 : index
    %c0_14 = arith.constant 0 : index
    %29 = vector.load %arg7[%c0_13, %c0_14] : memref<128x1xf32, #tpu.memory_space<vmem>>, vector<128x1xf32>
    %30 = vector.broadcast %29 : vector<128x1xf32> to vector<128x128xf32>
    %31 = arith.addf %28, %30 : vector<128x128xf32>
    %cst_15 = arith.constant 0.000000e+00 : f32
    %32 = vector.broadcast %cst_15 : f32 to vector<128x128xf32>
    %33 = arith.subf %32, %31 : vector<128x128xf32>
    %34 = math.exp %33 : vector<128x128xf32>
    %cst_16 = arith.constant 1.000000e+00 : f32
    %35 = vector.broadcast %cst_16 : f32 to vector<128x128xf32>
    %36 = arith.addf %35, %34 : vector<128x128xf32>
    %37 = tpu.reciprocal %36 {approx = true} : vector<128x128xf32> -> vector<128x128xf32>
    %38 = arith.mulf %31, %37 : vector<128x128xf32>
    %39 = vector.broadcast %3 : vector<128x1xf32> to vector<128x128xf32>
    %40 = arith.mulf %38, %39 : vector<128x128xf32>
    %c0_17 = arith.constant 0 : index
    %c0_18 = arith.constant 0 : index
    %41 = vector.load %arg8[%c0_17, %c0_18] : memref<128x128xbf16, #tpu.memory_space<vmem>>, vector<128x128xbf16>
    %42 = arith.truncf %40 : vector<128x128xf32> to vector<128x128xbf16>
    %cst_19 = arith.constant dense<0.000000e+00> : vector<128x128xf32>
    %43 = tpu.matmul %41, %42, %cst_19 {dimension_numbers = #tpu.dot_dimension_numbers<[1], [0], [0], [1], [0, 0, 1, 1], [], []>} : vector<128x128xbf16>, vector<128x128xbf16>, vector<128x128xf32> -> vector<128x128xf32>
    %c0_20 = arith.constant 0 : index
    %c0_21 = arith.constant 0 : index
    %44 = vector.load %arg9[%c0_20, %c0_21] : memref<128x1xf32, #tpu.memory_space<vmem>>, vector<128x1xf32>
    %45 = vector.broadcast %44 : vector<128x1xf32> to vector<128x128xf32>
    %46 = arith.addf %43, %45 : vector<128x128xf32>
    %cst_22 = arith.constant 0.000000e+00 : f32
    %47 = vector.broadcast %cst_22 : f32 to vector<128x128xf32>
    %48 = arith.subf %47, %46 : vector<128x128xf32>
    %49 = math.exp %48 : vector<128x128xf32>
    %cst_23 = arith.constant 1.000000e+00 : f32
    %50 = vector.broadcast %cst_23 : f32 to vector<128x128xf32>
    %51 = arith.addf %50, %49 : vector<128x128xf32>
    %52 = tpu.reciprocal %51 {approx = true} : vector<128x128xf32> -> vector<128x128xf32>
    %53 = arith.mulf %46, %52 : vector<128x128xf32>
    %c0_24 = arith.constant 0 : index
    %c0_25 = arith.constant 0 : index
    %54 = vector.load %arg10[%c0_24, %c0_25] : memref<8x128xbf16, #tpu.memory_space<vmem>>, vector<8x128xbf16>
    %55 = arith.truncf %53 : vector<128x128xf32> to vector<128x128xbf16>
    %cst_26 = arith.constant dense<0.000000e+00> : vector<8x128xf32>
    %56 = tpu.matmul %54, %55, %cst_26 {dimension_numbers = #tpu.dot_dimension_numbers<[1], [0], [0], [1], [0, 0, 1, 1], [], []>} : vector<8x128xbf16>, vector<128x128xbf16>, vector<8x128xf32> -> vector<8x128xf32>
    %c0_27 = arith.constant 0 : index
    %c0_28 = arith.constant 0 : index
    %57 = vector.load %arg11[%c0_27, %c0_28] : memref<8x1xf32, #tpu.memory_space<vmem>>, vector<8x1xf32>
    %58 = vector.broadcast %57 : vector<8x1xf32> to vector<8x128xf32>
    %59 = arith.addf %56, %58 : vector<8x128xf32>
    %cst_29 = arith.constant 0.000000e+00 : f32
    %60 = vector.broadcast %cst_29 : f32 to vector<8x128xf32>
    %61 = arith.subf %60, %59 : vector<8x128xf32>
    %62 = math.exp %61 : vector<8x128xf32>
    %cst_30 = arith.constant 1.000000e+00 : f32
    %63 = vector.broadcast %cst_30 : f32 to vector<8x128xf32>
    %64 = arith.addf %63, %62 : vector<8x128xf32>
    %65 = tpu.reciprocal %64 {approx = true} : vector<8x128xf32> -> vector<8x128xf32>
    %66 = arith.mulf %59, %65 : vector<8x128xf32>
    %c0_31 = arith.constant 0 : index
    %c0_32 = arith.constant 0 : index
    %c0_33 = arith.constant 0 : index
    %67 = vector.load %arg12[%c0_31, %c0_32, %c0_33] : memref<1x8x128xf32, #tpu.memory_space<vmem>>, vector<1x8x128xf32>
    %68 = vector.shape_cast %67 : vector<1x8x128xf32> to vector<8x128xf32>
    %69 = vector.shape_cast %66 : vector<8x128xf32> to vector<1x8x128xf32>
    tpu.vector_store %arg12[%c0_31, %c0_32, %c0_33], %69 {strides = array<i32>} : memref<1x8x128xf32, #tpu.memory_space<vmem>>, vector<1x8x128xf32>,
    return
  }
  func.func @transform_0(%arg0: i32, %arg1: i32) -> (i32, i32, i32) {
    %c0_i32 = arith.constant 0 : i32
    %c0_i32_0 = arith.constant 0 : i32
    return %arg0, %c0_i32, %arg1 : i32, i32, i32
  }
  func.func @transform_1(%arg0: i32, %arg1: i32) -> (i32, i32, i32) {
    %c0_i32 = arith.constant 0 : i32
    %c0_i32_0 = arith.constant 0 : i32
    %c0_i32_1 = arith.constant 0 : i32
    return %arg0, %c0_i32, %c0_i32_0 : i32, i32, i32
  }
  func.func @transform_2(%arg0: i32, %arg1: i32) -> (i32, i32) {
    %c0_i32 = arith.constant 0 : i32
    %c0_i32_0 = arith.constant 0 : i32
    %c0_i32_1 = arith.constant 0 : i32
    return %c0_i32, %c0_i32_0 : i32, i32
  }
  func.func @transform_3(%arg0: i32, %arg1: i32) -> (i32, i32) {
    %c0_i32 = arith.constant 0 : i32
    %c0_i32_0 = arith.constant 0 : i32
    %c0_i32_1 = arith.constant 0 : i32
    return %c0_i32, %c0_i32_0 : i32, i32
  }
  func.func @transform_4(%arg0: i32, %arg1: i32) -> (i32, i32) {
    %c0_i32 = arith.constant 0 : i32
    %c0_i32_0 = arith.constant 0 : i32
    %c0_i32_1 = arith.constant 0 : i32
    return %c0_i32, %c0_i32_0 : i32, i32
  }
  func.func @transform_5(%arg0: i32, %arg1: i32) -> (i32, i32) {
    %c0_i32 = arith.constant 0 : i32
    %c0_i32_0 = arith.constant 0 : i32
    %c0_i32_1 = arith.constant 0 : i32
    return %c0_i32, %c0_i32_0 : i32, i32
  }
  func.func @transform_6(%arg0: i32, %arg1: i32) -> (i32, i32) {
    %c0_i32 = arith.constant 0 : i32
    %c0_i32_0 = arith.constant 0 : i32
    %c0_i32_1 = arith.constant 0 : i32
    return %c0_i32, %c0_i32_0 : i32, i32
  }
  func.func @transform_7(%arg0: i32, %arg1: i32) -> (i32, i32) {
    %c0_i32 = arith.constant 0 : i32
    %c0_i32_0 = arith.constant 0 : i32
    %c0_i32_1 = arith.constant 0 : i32
    return %c0_i32, %c0_i32_0 : i32, i32
  }
  func.func @transform_8(%arg0: i32, %arg1: i32) -> (i32, i32) {
    %c0_i32 = arith.constant 0 : i32
    %c0_i32_0 = arith.constant 0 : i32
    %c0_i32_1 = arith.constant 0 : i32
    return %c0_i32, %c0_i32_0 : i32, i32
  }
  func.func @transform_9(%arg0: i32, %arg1: i32) -> (i32, i32) {
    %c0_i32 = arith.constant 0 : i32
    %c0_i32_0 = arith.constant 0 : i32
    %c0_i32_1 = arith.constant 0 : i32
    return %c0_i32, %c0_i32_0 : i32, i32
  }
  func.func @transform_10(%arg0: i32, %arg1: i32) -> (i32, i32, i32) {
    %c0_i32 = arith.constant 0 : i32
    %c0_i32_0 = arith.constant 0 : i32
    return %arg0, %c0_i32, %arg1 : i32, i32, i32
  }
}

</mosaic_0001>

<bundles_post_ra>
// kernel: fullnet_forward.2
= control target key start
LH: loop header
LB: loop body
LE: loop exit
PB: predicated region body
PF: predicated region fallthrough
CT: control target
= control target key end

     0   :  { %v1032_v1 = vmov 0   ;;  %vm137_vm0 = vcmask 64512   ;;  %s1297_s0 = inlined_call_operand.vmem [shape: f32[2,136], index: 0, kind: input, shape index: {}]   ;;  %s1298_s1 = inlined_call_operand.vmem [shape: bf16[136,128], index: 1, kind: input, shape index: {}]   ;;  %s1299_s2 = inlined_call_operand.vmem [shape: f32[1,128], index: 2, kind: input, shape index: {}]   ;;  %s1300_s3 = inlined_call_operand.vmem [shape: bf16[128,64], index: 3, kind: input, shape index: {}]   ;;  %s1301_s4 = inlined_call_operand.vmem [shape: f32[1,64], index: 4, kind: input, shape index: {}]   ;;  %s1302_s5 = inlined_call_operand.vmem [shape: bf16[64,128], index: 5, kind: input, shape index: {}]   ;;  %s1303_s6 = inlined_call_operand.vmem [shape: f32[1,128], index: 6, kind: input, shape index: {}]   ;;  %s1304_s7 = inlined_call_operand.vmem [shape: bf16[128,32], index: 7, kind: input, shape index: {}]   ;;  %s1305_s8 = inlined_call_operand.vmem [shape: f32[1,32], index: 8, kind: input, shape index: {}]   ;;  %s1306_s9 = inlined_call_operand.vmem [shape: bf16[32,32], index: 9, kind: input, shape index: {}]   ;;  %s1307_s10 = inlined_call_operand.vmem [shape: f32[1,32], index: 10, kind: input, shape index: {}]   ;;  %s1308_s11 = inlined_call_operand.vmem [shape: bf16[32,258], index: 11, kind: input, shape index: {}]   ;;  %s1309_s12 = inlined_call_operand.vmem [shape: f32[1,258], index: 12, kind: input, shape index: {}]   ;;  %s1310_s13 = inlined_call_operand.vmem [shape: f32[2,128], index: 13, kind: output, shape index: {0}]   ;;  %s1311_s14 = inlined_call_operand.hbm [shape: f32[2,258], index: 14, kind: output, shape index: {1}]  }
   0x1   :  { %v941_v0 = vld [vmem:[%s1298_s1 + $0x38] sm:$0xff]   ;;  %145 = vmatprep.subr.bf16.mxu0 %v1032_v1  ;;  %v942_v2 = vld [vmem:[%s1298_s1 + $0x30] sm:$0xff]   ;;  %v943_v3 = vld [vmem:[%s1298_s1 + $0x28] sm:$0xff]  }
   0x2   :  { %146 = vmatpush1.bf16.msra.mxu0 %v941_v0  ;;  %v944_v4 = vld [vmem:[%s1298_s1 + $0x20] sm:$0xff]   ;;  %v945_v7 = vld [vmem:[%s1298_s1 + $0x18] sm:$0xff]   ;;  %v946_v9 = vld [vmem:[%s1298_s1 + $0x10] sm:$0xff]  }
   0x3   :  { %147 = vmatprep.subr.bf16.mxu0 %v1032_v1  ;;  %v791_v5 = vld.sshfl [vmem:[%s1297_s0] sm:$0x33 pattern:$0x76325410]  ;;  %v947_v10 = vld [vmem:[%s1298_s1 + $0x8] sm:$0xff]  }
   0x4   :  { %v57_v6 = vcombine.high %v791_v5, %v791_v5  ;;  %v948_v11 = vld [vmem:[%s1298_s1] sm:$0xff]  }
   0x5   :  { %v949_v12 = vld [vmem:[%s1298_s1 + $0x40] ss:$0 sps:$4 sm:$0xff]  }
   0x6   :  { %148 = vmatpush1.bf16.msra.mxu0 %v942_v2  ;;  %v61_v8 = vpack.c.bf16 %v57_v6, %v57_v6 }
   0x7   :  { %149 = vmatprep.subr.bf16.mxu0 %v1032_v1 }
   0x8   :  { %802 = vmatprep.mubr.msk.bf16.mxu0 %vm137_vm0, %v61_v8 }
   0xa   :  { %150 = vmatpush1.bf16.msra.mxu0 %v943_v3 }
   0xb   :  { %151 = vmatprep.subr.bf16.mxu0 %v1032_v1 }
   0xe   :  { %152 = vmatpush1.bf16.msra.mxu0 %v944_v4 }
   0xf   :  { %153 = vmatprep.subr.bf16.mxu0 %v1032_v1 }
  0x12   :  { %154 = vmatpush1.bf16.msra.mxu0 %v945_v7 }
  0x13   :  { %155 = vmatprep.subr.bf16.mxu0 %v1032_v1 }
  0x16   :  { %156 = vmatpush1.bf16.msra.mxu0 %v946_v9 }
  0x17   :  { %157 = vmatprep.subr.bf16.mxu0 %v1032_v1 }
  0x1a   :  { %158 = vmatpush1.bf16.msra.mxu0 %v947_v10 }
  0x1b   :  { %159 = vmatprep.subr.bf16.mxu0 %v1032_v1 }
  0x1c   :  { %20 = vsyncpa [#allocation3], 0  ;;  %vm141_vm1 = vcmask 1043456   ;;  %v60_v14 = vpack.c.bf16 %v791_v5, %v791_v5  ;;  %v950_v15 = vld [vmem:[%s1300_s3 + $0x38] sm:$0xff]   ;;  %v1033_v16 = vmov 0.0   ;;  %v951_v17 = vld [vmem:[%s1300_s3 + $0x30] sm:$0xff]  }
  0x1d   :  { %v143_v13 = vsel %vm141_vm1, %v949_v12, 0  ;;  %868 = vmatprep.subr.bf16.mxu1 %v1033_v16  ;;  %v952_v18 = vld [vmem:[%s1300_s3 + $0x28] sm:$0xff]   ;;  %v953_v19 = vld [vmem:[%s1300_s3 + $0x20] sm:$0xff]   ;;  %v954_v20 = vld [vmem:[%s1300_s3 + $0x18] sm:$0xff]   ;;  %vm1034_vm2 = vmmov 0   ;;  %vm349_vm3 = vcmask 523264  }
  0x1e   :  { %160 = vmatpush1.bf16.msra.mxu0 %v948_v11  ;;  %869 = vmatpush3.bf16.msra.mxu1 %v950_v15  ;;  %v955_v21 = vld [vmem:[%s1300_s3 + $0x10] sm:$0xff]   ;;  %v956_v22 = vld [vmem:[%s1300_s3 + $0x8] sm:$0xff]   ;;  %v957_v23 = vld [vmem:[%s1300_s3] sm:$0xff]   ;;  %vm537_vm4 = vcmask 261120   ;;  %vm767_vm5 = vcmask 1041408   ;;  %vm768_vm6 = vcmask 1043458  }
  0x1f   :  { %175 = vmatprep.subr.bf16.mxu0 %v1032_v1  ;;  %870 = vmatprep.subr.bf16.mxu1 %v1033_v16  ;;  %v792_v24 = vld [vmem:[%s1299_s2] ss:$0 sm:$0xff]  ;;  %v958_v37 = vld [vmem:[%s1302_s5 + $0x18] sm:$0xff]   ;;  %v959_v38 = vld [vmem:[%s1302_s5 + $0x10] sm:$0xff]   ;;  %vm770_vm8 = vcmask 13316  }
  0x20   :  { %884 = vmatprep.mubr.msk.bf16.mxu1 %vm1034_vm2, %v1033_v16  ;;  %v960_v39 = vld [vmem:[%s1302_s5 + $0x8] sm:$0xff]   ;;  %v961_v40 = vld [vmem:[%s1302_s5] sm:$0xff]   ;;  %v962_v41 = vld [vmem:[%s1304_s7 + $0x38] sm:$0xff]  }
  0x21   :  { %v963_v42 = vld [vmem:[%s1304_s7 + $0x30] sm:$0xff]   ;;  %v964_v43 = vld [vmem:[%s1304_s7 + $0x28] sm:$0xff]   ;;  %v803_v44 = vld [vmem:[%s1301_s4] ss:$0 sm:$0xff] }
  0x22   :  { %176 = vmatpush2.bf16.msra.mxu0 %v143_v13  ;;  %871 = vmatpush3.bf16.msra.mxu1 %v951_v17  ;;  %v965_v57 = vld [vmem:[%s1304_s7 + $0x20] sm:$0xff]   ;;  %v966_v58 = vld [vmem:[%s1304_s7 + $0x18] sm:$0xff]   ;;  %v967_v59 = vld [vmem:[%s1304_s7 + $0x10] sm:$0xff]  }
  0x23   :  { %900 = vmatprep.subr.bf16.mxu0 %v1033_v16  ;;  %872 = vmatprep.subr.bf16.mxu1 %v1033_v16  ;;  %v968_v60 = vld [vmem:[%s1304_s7 + $0x8] sm:$0xff]   ;;  %v969_v61 = vld [vmem:[%s1304_s7] sm:$0xff]   ;;  %vm769_vm7 = vmor %vm768_vm6, %vm767_vm5 }
  0x24   :  { %v812_v62 = vld [vmem:[%s1303_s6] ss:$0 sm:$0xff]  ;;  %v970_v7 = vld [vmem:[%s1306_s9 + $0x8] sm:$0xff]   ;;  %vm771_vm9 = vmor %vm770_vm8, %vm769_vm7 }
  0x25   :  { %178 = vmatmul.mubr.bf16.vlgmr.msra.gmra.mxu0 %v60_v14  ;;  %v971_v8 = vld [vmem:[%s1306_s9] sm:$0xff]  }
  0x26   :  { %873 = vmatpush3.bf16.msra.mxu1 %v952_v18  ;;  %916 = vmatprep.mubr.msk.bf16.mxu0 %vm1034_vm2, %v1033_v16  ;;  %v818_v9 = vld [vmem:[%s1305_s8] ss:$0 sm:$0xff] }
  0x27   :  { %874 = vmatprep.subr.bf16.mxu1 %v1033_v16  ;;  %901 = vmatpush3.bf16.msra.mxu0 %v962_v41  ;;  %v598_v41 = vlaneseq }
  0x28   :  { %902 = vmatprep.subr.bf16.mxu0 %v1033_v16 }
  0x2a   :  { %875 = vmatpush3.bf16.msra.mxu1 %v953_v19 }
  0x2b   :  { %876 = vmatprep.subr.bf16.mxu1 %v1033_v16  ;;  %903 = vmatpush3.bf16.msra.mxu0 %v963_v42  ;;  %v599_v42 = vshrl.u32 %v598_v41, 7 }
  0x2c   :  { %904 = vmatprep.subr.bf16.mxu0 %v1033_v16 }
  0x2e   :  { %877 = vmatpush3.bf16.msra.mxu1 %v954_v20 }
  0x2f   :  { %878 = vmatprep.subr.bf16.mxu1 %v1033_v16  ;;  %905 = vmatpush3.bf16.msra.mxu0 %v964_v43  ;;  %v600_v43 = vsub.s32 0, %v599_v42 }
  0x30   :  { %906 = vmatprep.subr.bf16.mxu0 %v1033_v16 }
  0x32   :  { %879 = vmatpush3.bf16.msra.mxu1 %v955_v21 }
  0x33   :  { %880 = vmatprep.subr.bf16.mxu1 %v1033_v16  ;;  %907 = vmatpush3.bf16.msra.mxu0 %v965_v57 }
  0x34   :  { %908 = vmatprep.subr.bf16.mxu0 %v1033_v16 }
  0x36   :  { %881 = vmatpush3.bf16.msra.mxu1 %v956_v22 }
  0x37   :  { %882 = vmatprep.subr.bf16.mxu1 %v1033_v16  ;;  %909 = vmatpush3.bf16.msra.mxu0 %v966_v58 }
  0x38   :  { %910 = vmatprep.subr.bf16.mxu0 %v1033_v16 }
  0x3a   :  { %883 = vmatpush3.bf16.msra.mxu1 %v957_v23  ;;  %v974_v23 = vld [vmem:[%s1308_s11 + $0x1c] ss:$12 sps:$4 sm:$0xff]  }
  0x3b   :  { %888 = vmatprep.subr.bf16.mxu1 %v1033_v16  ;;  %911 = vmatpush3.bf16.msra.mxu0 %v967_v59 }
  0x3c   :  { %912 = vmatprep.subr.bf16.mxu0 %v1033_v16 }
  0x3f   :  { %913 = vmatpush3.bf16.msra.mxu0 %v968_v60 }
  0x40   :  { %914 = vmatprep.subr.bf16.mxu0 %v1033_v16 }
  0x43   :  { %915 = vmatpush3.bf16.msra.mxu0 %v969_v61 }
  0xe5   :  { %v179_v25 = vpop.f32.mrf.mxu0 }
  0xe6   :  { %v180_v26 = vadd.f32 %v792_v24, %v179_v25  ;;  %v972_v24 = vld [vmem:[%s1308_s11 + $0x18] ss:$12 sps:$4 sm:$0xff]  }
  0xe7   :  { %v181_v27 = vpop.f32.mrf.mxu0  ;;  %v977_v25 = vld [vmem:[%s1308_s11 + $0x4] ss:$12 sps:$4 sm:$0xff]  }
  0xe8   :  { %v185_v28 = vsub.f32 0.0, %v180_v26 }
  0xe9   :  { %v182_v29 = vpop.f32.mrf.mxu0 }
  0xea   :  { %v186_v30 = vmul.f32 1.442695, %v185_v28 }
  0xeb   :  { %v183_v31 = vpop.f32.mrf.mxu0 }
  0xec   :  { %980 = vpow2.f32 %v186_v30 }
  0xf9   :  { %v981_v32 = vpop.eup %980 }
  0xfa   :  { %v188_v33 = vadd.f32 1.0, %v981_v32 }
  0xfc   :  { %982 = vrcp.f32 %v188_v33 }
 0x109   :  { %v983_v34 = vpop.eup %982 }
 0x10a   :  { %v190_v35 = vmul.f32 %v983_v34, %v180_v26  ;;  %v975_v26 = vld [vmem:[%s1308_s11] ss:$12 sps:$4 sm:$0xff]  }
 0x10c   :  { %v191_v36 = vpack.c.bf16 %v190_v35, %v190_v35 }
 0x10e   :  { %885 = vmatmul.mubr.bf16.vlgmr.msra.gmra.mxu1 %v191_v36 }
 0x10f   :  { %896 = vmatprep.mubr.msk.bf16.mxu1 %vm1034_vm2, %v1033_v16  ;;  %889 = vmatpush3.bf16.msra.mxu1 %v958_v37 }
 0x110   :  { %890 = vmatprep.subr.bf16.mxu1 %v1033_v16 }
 0x113   :  { %891 = vmatpush3.bf16.msra.mxu1 %v959_v38  ;;  %v978_v38 = vld [vmem:[%s1308_s11 + $0x20] ss:$12 sps:$4 sm:$0xff]  }
 0x114   :  { %892 = vmatprep.subr.bf16.mxu1 %v1033_v16 }
 0x117   :  { %893 = vmatpush3.bf16.msra.mxu1 %v960_v39 }
 0x118   :  { %894 = vmatprep.subr.bf16.mxu1 %v1033_v16 }
 0x11b   :  { %895 = vmatpush3.bf16.msra.mxu1 %v961_v40  ;;  %v979_v40 = vld [vmem:[%s1308_s11 + $0x8] ss:$12 sps:$4 sm:$0xff]   ;;  %s1036_s11 = smov [#allocation2]  }
 0x11c   :  { %920 = vmatprep.subr.bf16.mxu1 %v1033_v16 }
 0x1ce   :  { %v297_v45 = vpop.f32.mrf.mxu1 }
 0x1cf   :  { %v298_v46 = vadd.f32 %v803_v44, %v297_v45  ;;  %v596_v44 = vld [vmem:[%s1309_s12] sm:$0x7]  ;;  %v604_v45 = vsub.s32 1, %v599_v42  ;;  %s781_s12 = sshll.u32 %s1036_s11, 4  ;;  %s782_s12 = int_to_ptr.vmem [resolvable:$true] %s781_s12 }
 0x1d0   :  { %v886_v47 = vpop.f32.mrf.mxu1  ;;  %s1010_s16 = scalar_lea.vmem %s782_s12, 96  ;;  %p1015_p1 = scmp.lt.s32.totalorder %s782_s12, %s782_s12 }
 0x1d1   :  { %v303_v48 = vsub.f32 0.0, %v298_v46  ;;  %v605_v47 = vrot.slane %v596_v44, %v604_v45  ;;  %p1011_p0 = scmp.ne.s32.totalorder %s782_s12, %s1010_s16  ;;  %p1016_p2 = scmp.lt.s32.totalorder %s1010_s16, %s1010_s16 }
 0x1d2   :  { %v300_v49 = vpop.f32.mrf.mxu1 }
 0x1d3   :  { %v304_v50 = vmul.f32 1.442695, %v303_v48  ;;  %p1017_p3 = por %p1016_p2, %p1015_p1 }
 0x1d4   :  { %v887_v51 = vpop.f32.mrf.mxu1 }
 0x1d5   :  { %984 = vpow2.f32 %v304_v50  ;;  %v608_v50 = vsub.s32 2, %v599_v42  ;;  %p1018_p4 = pnand %p1017_p3, %p1011_p0 }
 0x1e2   :  { %v985_v52 = vpop.eup %984 }
 0x1e3   :  { %v306_v53 = vadd.f32 1.0, %v985_v52 }
 0x1e5   :  { %986 = vrcp.f32 %v306_v53 }
 0x1f2   :  { %v987_v54 = vpop.eup %986 }
 0x1f3   :  { %v308_v55 = vmul.f32 %v987_v54, %v298_v46  ;;  %v601_v46 = vrot.slane %v596_v44, %v600_v43 }
 0x1f5   :  { %v309_v56 = vpack.c.bf16 %v308_v55, %v308_v55 }
 0x1f7   :  { %897 = vmatmul.mubr.msk.bf16.vlgmr.msra.gmra.mxu1 %vm349_vm3, %v309_v56  ;;  %v609_v56 = vrot.slane %v596_v44, %v608_v50 }
 0x1f8   :  { %924 = vmatprep.mubr.msk.bf16.mxu1 %vm1034_vm2, %v1033_v16  ;;  %921 = vmatpush3.bf16.msra.mxu1 %v970_v7 }
 0x1f9   :  { %922 = vmatprep.subr.bf16.mxu1 %v1033_v16 }
 0x1fc   :  { %923 = vmatpush3.bf16.msra.mxu1 %v971_v8 }
 0x1fd   :  { %660 = vmatprep.subr.bf16.mxu1 %v974_v23 }
 0x2b7   :  { %v387_v63 = vpop.f32.mrf.mxu1 }
 0x2b8   :  { %v388_v0 = vadd.f32 %v812_v62, %v387_v63 }
 0x2b9   :  { %v898_v2 = vpop.f32.mrf.mxu1 }
 0x2ba   :  { %988 = vtanh.f32 %v388_v0 }
 0x2bb   :  { %v390_v3 = vpop.f32.mrf.mxu1 }
 0x2bd   :  { %v899_v4 = vpop.f32.mrf.mxu1 }
 0x2c7   :  { %v989_v5 = vpop.eup %988 }
 0x2c8   :  { %394 = vst [vmem:[%s1310_s13] sm:$0x3] %v989_v5  ;;  %v395_v6 = vpack.c.bf16 %v989_v5, %v989_v5 }
 0x2ca   :  { %917 = vmatmul.mubr.bf16.vlgmr.msra.gmra.mxu0 %v395_v6 }
 0x38a   :  { %v501_v10 = vpop.f32.mrf.mxu0 }
 0x38b   :  { %v502_v11 = vadd.f32 %v818_v9, %v501_v10  ;;  %v1035_v9 = vmov 1983009808  }
 0x38c   :  { %v918_v12 = vpop.f32.mrf.mxu0  ;;  %v752_v10 = vunpack.c.l.s4 %v1035_v9 }
 0x38d   :  { %v507_v13 = vsub.f32 0.0, %v502_v11 }
 0x38e   :  { %v504_v14 = vpop.f32.mrf.mxu0 }
 0x38f   :  { %v508_v15 = vmul.f32 1.442695, %v507_v13  ;;  %v753_v14 = vunpack.c.0.s8 %v752_v10 }
 0x390   :  { %v919_v17 = vpop.f32.mrf.mxu0 }
 0x391   :  { %990 = vpow2.f32 %v508_v15 }
 0x39e   :  { %v991_v18 = vpop.eup %990 }
 0x39f   :  { %v510_v19 = vadd.f32 1.0, %v991_v18  ;;  %v756_v18 = vsub.s32 %v753_v14, %v599_v42 }
 0x3a1   :  { %992 = vrcp.f32 %v510_v19 }
 0x3ae   :  { %v993_v20 = vpop.eup %992 }
 0x3af   :  { %v512_v21 = vmul.f32 %v993_v20, %v502_v11 }
 0x3b1   :  { %v513_v22 = vpack.c.bf16 %v512_v21, %v512_v21 }
 0x3b3   :  { %925 = vmatmul.mubr.msk.bf16.vlgmr.msra.gmra.mxu1 %vm537_vm4, %v513_v22 }
 0x3b4   :  { %680 = vmatprep.mubr.bf16.mxu1 %v1032_v1  ;;  %661 = vmatpush1.bf16.msra.mxu1 %v972_v24  ;;  %v827_v1 = vld [vmem:[%s1307_s10] ss:$0 sm:$0xff] }
 0x3b5   :  { %662 = vmatprep.subr.bf16.mxu1 %v977_v25 }
 0x3b8   :  { %663 = vmatpush1.bf16.msra.mxu1 %v975_v26 }
 0x3b9   :  { %928 = vmatprep.subr.bf16.mxu1 %v1033_v16 }
 0x473   :  { %v575_v27 = vpop.f32.mrf.mxu1 }
 0x474   :  { %v576_v28 = vadd.f32 %v827_v1, %v575_v27 }
 0x475   :  { %v926_v29 = vpop.f32.mrf.mxu1 }
 0x476   :  { %v581_v30 = vsub.f32 0.0, %v576_v28 }
 0x477   :  { %v578_v31 = vpop.f32.mrf.mxu1 }
 0x478   :  { %v582_v32 = vmul.f32 1.442695, %v581_v30 }
 0x479   :  { %v927_v33 = vpop.f32.mrf.mxu1 }
 0x47a   :  { %994 = vpow2.f32 %v582_v32 }
 0x487   :  { %v995_v34 = vpop.eup %994 }
 0x488   :  { %v584_v35 = vadd.f32 1.0, %v995_v34 }
 0x48a   :  { %996 = vrcp.f32 %v584_v35 }
 0x497   :  { %v997_v36 = vpop.eup %996 }
 0x498   :  { %v586_v37 = vmul.f32 %v997_v36, %v576_v28 }
 0x49a   :  { %v587_v39 = vpack.c.bf16 %v586_v37, %v586_v37 }
 0x49c   :  { %837 = vmatmul.mubr.msk.bf16.vlgmr.msra.gmra.mxu1 %vm537_vm4, %v587_v39 }
 0x49d   :  { %929 = vmatpush3.bf16.msra.mxu1 %v978_v38  ;;  %932 = vmatprep.mubr.msk.bf16.mxu1 %vm1034_vm2, %v1033_v16 }
 0x49e   :  { %930 = vmatprep.subr.bf16.mxu1 %v1033_v16 }
 0x4a1   :  { %931 = vmatpush3.bf16.msra.mxu1 %v979_v40 }
 0x4a4   :  { %933 = vmatmul.mubr.msk.bf16.vlgmr.msra.gmra.mxu1 %vm537_vm4, %v587_v39 }
 0x55c   :  { %v682_v48 = vpop.f32.mrf.mxu1 }
 0x55d   :  { %v683_v49 = vadd.f32 %v682_v48, %v601_v46 }
 0x55e   :  { %v684_v51 = vpop.f32.mrf.mxu1 }
 0x55f   :  { %v729_v52 = vsub.f32 0.0, %v683_v49  ;;  %v685_v53 = vadd.f32 %v684_v51, %v605_v47 }
 0x560   :  { %v686_v16 = vpop.f32.mrf.mxu1 }
 0x561   :  { %v732_v54 = vmul.f32 1.442695, %v729_v52  ;;  %v730_v55 = vsub.f32 0.0, %v685_v53 }
 0x562   :  { %v687_v57 = vpop.f32.mrf.mxu1 }
 0x563   :  { %998 = vpow2.f32 %v732_v54  ;;  %v734_v58 = vmul.f32 1.442695, %v730_v55 }
 0x564   :  { %v723_v59 = vpop.f32.mrf.mxu1 }
 0x565   :  { %1000 = vpow2.f32 %v734_v58  ;;  %v724_v60 = vadd.f32 %v723_v59, %v609_v56 }
 0x566   :  { %v934_v61 = vpop.f32.mrf.mxu1 }
 0x567   :  { %v731_v62 = vsub.f32 0.0, %v724_v60 }
 0x568   :  { %v726_v63 = vpop.f32.mrf.mxu1 }
 0x569   :  { %v736_v0 = vmul.f32 1.442695, %v731_v62 }
 0x56a   :  { %v935_v2 = vpop.f32.mrf.mxu1 }
 0x56b   :  { %1002 = vpow2.f32 %v736_v0 }
 0x570   :  { %v999_v3 = vpop.eup %998 }
 0x571   :  { %v738_v4 = vadd.f32 1.0, %v999_v3 }
 0x572   :  { %v1001_v5 = vpop.eup %1000 }
 0x573   :  { %v739_v6 = vadd.f32 1.0, %v1001_v5  ;;  %1004 = vrcp.f32 %v738_v4 }
 0x575   :  { %1006 = vrcp.f32 %v739_v6 }
 0x578   :  { %v1003_v7 = vpop.eup %1002 }
 0x579   :  { %v740_v8 = vadd.f32 1.0, %v1003_v7 }
 0x57b   :  { %1008 = vrcp.f32 %v740_v8 }
 0x580   :  { %v1005_v11 = vpop.eup %1004 }
 0x581   :  { %v744_v15 = vmul.f32 %v1005_v11, %v683_v49 }
 0x582   :  { %v1007_v12 = vpop.eup %1006 }
 0x583   :  { %v745_v13 = vmul.f32 %v1007_v12, %v685_v53 }
 0x585   :  { %v750_v17 = vcombine.low %v744_v15, %v745_v13 }
 0x587   :  { %v757_v22 = vrot.slane %v750_v17, %v756_v18 }
 0x588   :  { %v1009_v19 = vpop.eup %1008 }
 0x589   :  { %v746_v20 = vmul.f32 %v1009_v19, %v724_v60 }
 0x58b   :  { %v764_v21 = vrot.slane %v746_v20, %v756_v18 }
 0x58d   :  { %v765_v23 = vcombine.low %v757_v22, %v764_v21 }
 0x58f   :  { %772 = vst.msk [vmem:[#allocation2] sm:$0x3f] %vm771_vm9, %v765_v23 }
 0x590   :  { %1021 = shalt.err (!%p1018_p4)
}
 0x591   :  { %784 = dma.vmem_to_hbm [thread:$0]  %s782_s12, 96, %s1311_s14, [#allocation3]  }
 0x592   :  { %1030 = dma.done.wait [#allocation3], 96  }
 0x593   :  { %1031 = vsyncadd [#allocation3], 4294967200 }
 0x594   :  { %790 = vsyncpa [#allocation3], 1 }

// kernel: fullnet_forward.3
= control target key start
LH: loop header
LB: loop body
LE: loop exit
PB: predicated region body
PF: predicated region fallthrough
CT: control target
= control target key end

     0   :  { %s1870_s13 = smov 0   ;;  %s1872_s14 = smov 0   ;;  %s2252_s0 = inlined_call_operand.vmem [shape: f32[2,2,128], index: 0, kind: input, shape index: {}]   ;;  %s2253_s1 = inlined_call_operand.vmem [shape: f32[2,128,1], index: 1, kind: input, shape index: {}]   ;;  %s2254_s2 = inlined_call_operand.vmem [shape: f32[16,2], index: 2, kind: input, shape index: {}]   ;;  %s2255_s3 = inlined_call_operand.vmem [shape: f32[16,1], index: 3, kind: input, shape index: {}]   ;;  %s2256_s4 = inlined_call_operand.vmem [shape: bf16[128,16], index: 4, kind: input, shape index: {}]   ;;  %s2257_s5 = inlined_call_operand.vmem [shape: f32[128,1], index: 5, kind: input, shape index: {}]   ;;  %s2258_s6 = inlined_call_operand.vmem [shape: bf16[128,128], index: 6, kind: input, shape index: {}]   ;;  %s2259_s7 = inlined_call_operand.vmem [shape: f32[128,1], index: 7, kind: input, shape index: {}]   ;;  %s2260_s8 = inlined_call_operand.vmem [shape: bf16[8,128], index: 8, kind: input, shape index: {}]   ;;  %s2261_s9 = inlined_call_operand.vmem [shape: f32[8,1], index: 9, kind: input, shape index: {}]   ;;  %s2262_s10 = inlined_call_operand.vmem [shape: f32[2,8,128], index: 10, kind: output, shape index: {}]  }
   0x1   :  { %s1874_s15 = smov 0  }
   0x2 LB: > { %s32_s16 = sadd.s32 1, %s1805_s14  ;;  %p1464_p0 = scmp.ge.s32.totalorder %s1809_s15, 1  ;;  %s1809_s15 = sphi %s1874_s15, %s20_s15   ;;  %s1805_s14 = sphi %s1872_s14, %s2264_s14   ;;  %s1801_s13 = sphi %s1870_s13, %s2263_s13  }
   0x3   : > { %p34_p1 = scmp.ge.s32.totalorder %s32_s16, 2  ;;  %p340_p2 = scmp.lt.s32.totalorder %s1809_s15, 3 }
   0x5   : > { %s2266_s16 = smov (%p34_p1, %s32_s16), 0  ;;  %p341_p3 = pnand %p1464_p0, %p340_p2 }
   0x6   : > { %p387_p4 = scmp.lt.s32.totalorder (!%p341_p3), %s1801_s13, 1 }
   0x7   : > { %344 = sbr.rel (%p341_p3) target bundleno = 1010 (0x3f2), region = 60 }
   0xc   : > { %v424_v0 = vld [vmem:[%s2254_s2] sm:$0xff]  ;;  %v1811_v1 = vmov 1   ;;  %v1812_v2 = vmov 0   ;;  %v425_v3 = vld [vmem:[%s2254_s2 + $0x8] sm:$0xff]  ;;  %v515_v6 = vld [vmem:[%s2257_s5 + $0x70] sm:$0xff]  ;;  %s2268_s13 = smov (!%p387_p4, %s1801_s13), 1  ;;  %v436_v56 = vlaneseq }
   0xd   : > { %1629 = vset.pattern.permute.xlu1 %v1811_v1  ;;  %1628 = vset.pattern.permute.xlu0 %v1812_v2  ;;  %v458_v4 = vld [vmem:[%s2255_s3] sm:$0xff]  ;;  %v459_v5 = vld [vmem:[%s2255_s3 + $0x8] sm:$0xff]  ;;  %v516_v7 = vld [vmem:[%s2257_s5 + $0x78] sm:$0xff]  ;;  %s1495_s21 = sshll.u32 %s2268_s13, 7  ;;  %vm637_vm0 = vcmask 130048   ;;  %s1465_s17 = sshll.u32 %s2268_s13, 1 }
   0xe   : > { %443 = vperm.xlu1 %1629, %v424_v0   ;;  %428 = vperm.xlu0 %1628, %v424_v0   ;;  %v513_v8 = vld [vmem:[%s2257_s5 + $0x60] sm:$0xff]  ;;  %v514_v9 = vld [vmem:[%s2257_s5 + $0x68] sm:$0xff]  ;;  %v511_v10 = vld [vmem:[%s2257_s5 + $0x50] sm:$0xff]  ;;  %s1958_s28 = scalar_lea.vmem %s2253_s1, %s1495_s21  ;;  %v437_v57 = vshrl.u32 %v436_v56, 7  ;;  %s393_s20 = scalar_lea.vmem %s2252_s0, %s1465_s17  ;;  %vm1814_vm1 = vmmov 0  }
   0xf   : > { %v512_v11 = vld [vmem:[%s2257_s5 + $0x58] sm:$0xff]  ;;  %v509_v12 = vld [vmem:[%s2257_s5 + $0x40] sm:$0xff]  ;;  %v510_v13 = vld [vmem:[%s2257_s5 + $0x48] sm:$0xff]  ;;  %s1468_s21 = sshll.u32 %s2268_s13, 3 }
  0x10   : > { %v507_v14 = vld [vmem:[%s2257_s5 + $0x30] sm:$0xff]  ;;  %v508_v15 = vld [vmem:[%s2257_s5 + $0x38] sm:$0xff]  ;;  %v505_v16 = vld [vmem:[%s2257_s5 + $0x20] sm:$0xff]  ;;  %v452_v58 = vsub.s32 1, %v437_v57  ;;  %v438_v59 = vsub.s32 0, %v437_v57  ;;  %s405_s24 = scalar_lea.vmem %s2262_s10, %s1468_s21 }
  0x11   : > { %v506_v17 = vld [vmem:[%s2257_s5 + $0x28] sm:$0xff]  ;;  %v503_v18 = vld [vmem:[%s2257_s5 + $0x10] sm:$0xff]  ;;  %v504_v19 = vld [vmem:[%s2257_s5 + $0x18] sm:$0xff] }
  0x12   : > { %447 = vperm.xlu1 %1629, %v425_v3   ;;  %433 = vperm.xlu0 %1628, %v425_v3   ;;  %v501_v20 = vld [vmem:[%s2257_s5] sm:$0xff]  ;;  %v502_v21 = vld [vmem:[%s2257_s5 + $0x8] sm:$0xff]  ;;  %v422_v22 = vld [vmem:[%s1958_s28 + $0x70] sm:$0xff] }
  0x13   : > { %v423_v23 = vld [vmem:[%s1958_s28 + $0x78] sm:$0xff]  ;;  %v420_v24 = vld [vmem:[%s1958_s28 + $0x60] sm:$0xff]  ;;  %v421_v25 = vld [vmem:[%s1958_s28 + $0x68] sm:$0xff] }
  0x14   : > { %v1631_v26 = vld [vmem:[%s2256_s4] sm:$0xff]   ;;  %v418_v27 = vld [vmem:[%s1958_s28 + $0x50] sm:$0xff]  ;;  %v419_v28 = vld [vmem:[%s1958_s28 + $0x58] sm:$0xff] }
  0x15   : > { %1532 = vmatprep.mubr.msk.bf16.mxu0 %vm637_vm0, %v1631_v26  ;;  %v416_v29 = vld [vmem:[%s1958_s28 + $0x40] sm:$0xff]  ;;  %v417_v30 = vld [vmem:[%s1958_s28 + $0x48] sm:$0xff]  ;;  %v414_v31 = vld [vmem:[%s1958_s28 + $0x30] sm:$0xff] }
  0x16   : > { %1630 = vset.pattern.permute.xlu1 %v1812_v2  ;;  %462 = vperm.xlu0 %1628, %v458_v4   ;;  %v415_v32 = vld [vmem:[%s1958_s28 + $0x38] sm:$0xff]  ;;  %v412_v33 = vld [vmem:[%s1958_s28 + $0x20] sm:$0xff]  ;;  %v413_v34 = vld [vmem:[%s1958_s28 + $0x28] sm:$0xff] }
  0x17   : > { %467 = vperm.xlu1 %1630, %v459_v5   ;;  %v410_v35 = vld [vmem:[%s1958_s28 + $0x10] sm:$0xff]  ;;  %v411_v36 = vld [vmem:[%s1958_s28 + $0x18] sm:$0xff]  ;;  %v408_v37 = vld [vmem:[%s1958_s28] sm:$0xff] }
  0x18   : > { %v409_v38 = vld [vmem:[%s1958_s28 + $0x8] sm:$0xff]  ;;  %v989_v39 = vld [vmem:[%s2259_s7 + $0x70] sm:$0xff]  ;;  %v990_v40 = vld [vmem:[%s2259_s7 + $0x78] sm:$0xff] }
  0x19   : > { %v987_v41 = vld [vmem:[%s2259_s7 + $0x60] sm:$0xff]  ;;  %v988_v42 = vld [vmem:[%s2259_s7 + $0x68] sm:$0xff]  ;;  %v985_v43 = vld [vmem:[%s2259_s7 + $0x50] sm:$0xff] }
  0x1a   : > { %589 = vperm.xlu0 %1628, %v515_v6   ;;  %v986_v44 = vld [vmem:[%s2259_s7 + $0x58] sm:$0xff]  ;;  %v983_v45 = vld [vmem:[%s2259_s7 + $0x40] sm:$0xff]  ;;  %v984_v46 = vld [vmem:[%s2259_s7 + $0x48] sm:$0xff] }
  0x1b   : > { %594 = vperm.xlu1 %1630, %v516_v7   ;;  %v981_v47 = vld [vmem:[%s2259_s7 + $0x30] sm:$0xff]  ;;  %v982_v48 = vld [vmem:[%s2259_s7 + $0x38] sm:$0xff]  ;;  %v979_v49 = vld [vmem:[%s2259_s7 + $0x20] sm:$0xff] }
  0x1c   : > { %v980_v50 = vld [vmem:[%s2259_s7 + $0x28] sm:$0xff]  ;;  %v977_v51 = vld [vmem:[%s2259_s7 + $0x10] sm:$0xff]  ;;  %v978_v52 = vld [vmem:[%s2259_s7 + $0x18] sm:$0xff] }
  0x1d   : > { %v975_v53 = vld [vmem:[%s2259_s7] sm:$0xff]  ;;  %v976_v54 = vld [vmem:[%s2259_s7 + $0x8] sm:$0xff] }
  0x1e   : > { %579 = vperm.xlu0 %1628, %v513_v8   ;;  %v1321_v55 = vld [vmem:[%s2261_s9] sm:$0xff]  ;;  %v1632_v26 = vld [vmem:[%s2256_s4 + $0x8] sm:$0xff]  }
  0x1f   : > { %584 = vperm.xlu1 %1630, %v514_v9   ;;  %v407_v60 = vld [vmem:[%s393_s20] sm:$0x3] }
  0x20   : > { %v453_v61 = vrot.slane %v407_v60, %v452_v58  ;;  %v439_v62 = vrot.slane %v407_v60, %v438_v59 }
  0x22   : > { %569 = vperm.xlu0 %1628, %v511_v10  }
  0x23   : > { %574 = vperm.xlu1 %1630, %v512_v11  }
  0x26   : > { %559 = vperm.xlu0 %1628, %v509_v12  }
  0x27   : > { %564 = vperm.xlu1 %1630, %v510_v13  }
  0x2a   : > { %549 = vperm.xlu0 %1628, %v507_v14  }
  0x2b   : > { %554 = vperm.xlu1 %1630, %v508_v15  }
  0x2e   : > { %539 = vperm.xlu0 %1628, %v505_v16  }
  0x2f   : > { %544 = vperm.xlu1 %1630, %v506_v17  }
  0x32   : > { %529 = vperm.xlu0 %1628, %v503_v18  }
  0x33   : > { %534 = vperm.xlu1 %1630, %v504_v19  }
  0x36   : > { %519 = vperm.xlu0 %1628, %v501_v20  }
  0x37   : > { %524 = vperm.xlu1 %1630, %v502_v21  }
  0x3a   : > { %927 = vperm.xlu0 %1628, %v422_v22  }
  0x3b   : > { %932 = vperm.xlu1 %1630, %v423_v23  }
  0x3e   : > { %917 = vperm.xlu0 %1628, %v420_v24  }
  0x3f   : > { %922 = vperm.xlu1 %1630, %v421_v25  }
  0x42   : > { %907 = vperm.xlu0 %1628, %v418_v27   ;;  %v1633_v27 = vld [vmem:[%s2256_s4 + $0x10] sm:$0xff]  }
  0x43   : > { %912 = vperm.xlu1 %1630, %v419_v28   ;;  %v1634_v28 = vld [vmem:[%s2256_s4 + $0x18] sm:$0xff]  }
  0x46   : > { %897 = vperm.xlu0 %1628, %v416_v29   ;;  %v1635_v29 = vld [vmem:[%s2256_s4 + $0x20] sm:$0xff]  }
  0x47   : > { %902 = vperm.xlu1 %1630, %v417_v30   ;;  %v1636_v30 = vld [vmem:[%s2256_s4 + $0x28] sm:$0xff]  }
  0x4a   : > { %887 = vperm.xlu0 %1628, %v414_v31   ;;  %v1637_v31 = vld [vmem:[%s2256_s4 + $0x30] sm:$0xff]  }
  0x4b   : > { %892 = vperm.xlu1 %1630, %v415_v32   ;;  %v1638_v32 = vld [vmem:[%s2256_s4 + $0x38] sm:$0xff]  }
  0x4e   : > { %877 = vperm.xlu0 %1628, %v412_v33   ;;  %v1639_v33 = vld [vmem:[%s2258_s6] sm:$0xff]  }
  0x4f   : > { %882 = vperm.xlu1 %1630, %v413_v34   ;;  %1564 = vmatprep.mubr.bf16.mxu1 %v1639_v33 }
  0x52   : > { %867 = vperm.xlu0 %1628, %v410_v35  }
  0x53   : > { %872 = vperm.xlu1 %1630, %v411_v36  }
  0x56   : > { %857 = vperm.xlu0 %1628, %v408_v37  }
  0x57   : > { %862 = vperm.xlu1 %1630, %v409_v38  }
  0x5a   : > { %1063 = vperm.xlu0 %1628, %v989_v39  }
  0x5b   : > { %1068 = vperm.xlu1 %1630, %v990_v40  }
  0x5e   : > { %1053 = vperm.xlu0 %1628, %v987_v41  }
  0x5f   : > { %1058 = vperm.xlu1 %1630, %v988_v42  }
  0x62   : > { %1043 = vperm.xlu0 %1628, %v985_v43  }
  0x63   : > { %1048 = vperm.xlu1 %1630, %v986_v44  }
  0x66   : > { %1033 = vperm.xlu0 %1628, %v983_v45  }
  0x67   : > { %1038 = vperm.xlu1 %1630, %v984_v46  }
  0x6a   : > { %1023 = vperm.xlu0 %1628, %v981_v47  }
  0x6b   : > { %1028 = vperm.xlu1 %1630, %v982_v48  }
  0x6e   : > { %1013 = vperm.xlu0 %1628, %v979_v49  }
  0x6f   : > { %1018 = vperm.xlu1 %1630, %v980_v50  }
  0x72   : > { %1003 = vperm.xlu0 %1628, %v977_v51  }
  0x73   : > { %1008 = vperm.xlu1 %1630, %v978_v52  }
  0x76   : > { %993 = vperm.xlu0 %1628, %v975_v53  }
  0x77   : > { %998 = vperm.xlu1 %1630, %v976_v54  }
  0x7a   : > { %1324 = vperm.xlu0 %1628, %v1321_v55  }
  0x89   : > { %v444_v63 = vpop.permute.xlu1 %443  ;;  %v429_v0 = vpop.permute.xlu0 %428 }
  0x8a   : > { %v454_v1 = vmul.f32 %v453_v61, %v444_v63  ;;  %v440_v2 = vmul.f32 %v439_v62, %v429_v0 }
  0x8c   : > { %v456_v7 = vadd.f32 %v454_v1, %v440_v2 }
  0x8d   : > { %v448_v3 = vpop.permute.xlu1 %447  ;;  %v434_v4 = vpop.permute.xlu0 %433 }
  0x8e   : > { %v455_v5 = vmul.f32 %v453_v61, %v448_v3  ;;  %v441_v6 = vmul.f32 %v439_v62, %v434_v4 }
  0x90   : > { %v457_v8 = vadd.f32 %v455_v5, %v441_v6 }
  0x91   : > { %v463_v9 = vpop.permute.xlu0 %462 }
  0x92   : > { %v470_v10 = vadd.f32 %v463_v9, %v456_v7  ;;  %v468_v11 = vpop.permute.xlu1 %467 }
  0x93   : > { %v471_v12 = vadd.f32 %v468_v11, %v457_v8 }
  0x94   : > { %v472_v13 = vsub.f32 0.0, %v470_v10 }
  0x95   : > { %v473_v14 = vsub.f32 0.0, %v471_v12  ;;  %v590_v34 = vpop.permute.xlu0 %589 }
  0x96   : > { %v474_v15 = vmul.f32 1.442695, %v472_v13  ;;  %v595_v36 = vpop.permute.xlu1 %594 }
  0x97   : > { %v476_v16 = vmul.f32 1.442695, %v473_v14 }
  0x98   : > { %1647 = vpow2.f32 %v474_v15 }
  0x99   : > { %1649 = vpow2.f32 %v476_v16  ;;  %v580_v35 = vpop.permute.xlu0 %579 }
  0x9a   : > { %v585_v38 = vpop.permute.xlu1 %584 }
  0x9d   : > { %v570_v37 = vpop.permute.xlu0 %569 }
  0x9e   : > { %v575_v43 = vpop.permute.xlu1 %574 }
  0xa1   : > { %v560_v42 = vpop.permute.xlu0 %559 }
  0xa2   : > { %v565_v48 = vpop.permute.xlu1 %564 }
  0xa5   : > { %v1648_v17 = vpop.eup %1647  ;;  %v550_v47 = vpop.permute.xlu0 %549 }
  0xa6   : > { %v1650_v18 = vpop.eup %1649  ;;  %v478_v19 = vadd.f32 1.0, %v1648_v17  ;;  %v555_v53 = vpop.permute.xlu1 %554 }
  0xa7   : > { %v479_v20 = vadd.f32 1.0, %v1650_v18 }
  0xa8   : > { %1651 = vrcp.f32 %v478_v19 }
  0xa9   : > { %1653 = vrcp.f32 %v479_v20  ;;  %v540_v52 = vpop.permute.xlu0 %539 }
  0xaa   : > { %v545_v61 = vpop.permute.xlu1 %544 }
  0xad   : > { %v530_v59 = vpop.permute.xlu0 %529 }
  0xae   : > { %v535_v15 = vpop.permute.xlu1 %534 }
  0xb5   : > { %v1652_v21 = vpop.eup %1651 }
  0xb6   : > { %v1654_v22 = vpop.eup %1653  ;;  %v482_v23 = vmul.f32 %v1652_v21, %v470_v10  ;;  %v520_v10 = vpop.permute.xlu0 %519 }
  0xb7   : > { %v483_v24 = vmul.f32 %v1654_v22, %v471_v12 }
  0xb9   : > { %v500_v25 = vpack.c.bf16 %v483_v24, %v482_v23 }
  0xbb   : > { %1530 = vmatprep.subr.bf16.mxu0 %v500_v25 }
  0xbc   : > { %1531 = vmatpush3.bf16.msra.mxu0 %v500_v25 }
  0xbf   : > { %1533 = vmatmul.mubr.msk.bf16.vlgmr.msra.gmra.mxu0 %vm637_vm0, %v1632_v26 }
  0xc0   : > { %1536 = vmatprep.mubr.msk.bf16.mxu0 %vm637_vm0, %v1633_v27 }
  0xc7   : > { %1537 = vmatmul.mubr.msk.bf16.gmra.mxu0 %vm637_vm0, %v1634_v28 }
  0xc8   : > { %1540 = vmatprep.mubr.msk.bf16.mxu0 %vm637_vm0, %v1635_v29 }
  0xcf   : > { %1541 = vmatmul.mubr.msk.bf16.gmra.mxu0 %vm637_vm0, %v1636_v30 }
  0xd0   : > { %1544 = vmatprep.mubr.msk.bf16.mxu0 %vm637_vm0, %v1637_v31 }
  0xd7   : > { %1545 = vmatmul.mubr.msk.bf16.gmra.mxu0 %vm637_vm0, %v1638_v32 }
 0x17f   : > { %v1534_v39 = vpop.f32.mrf.mxu0 }
 0x180   : > { %v2089_v16 = vadd.f32 %v1534_v39, %v530_v59 }
 0x181   : > { %v696_v40 = vpop.f32.mrf.mxu0 }
 0x182   : > { %v2091_v17 = vadd.f32 %v696_v40, %v520_v10  ;;  %v761_v32 = vsub.f32 0.0, %v2089_v16 }
 0x183   : > { %v1535_v41 = vpop.f32.mrf.mxu0 }
 0x184   : > { %v2107_v33 = vadd.f32 %v1535_v41, %v535_v15 }
 0x185   : > { %v2066_v44 = vpop.f32.mrf.mxu0 }
 0x186   : > { %v762_v41 = vsub.f32 0.0, %v2107_v33 }
 0x187   : > { %v1538_v45 = vpop.f32.mrf.mxu0 }
 0x188   : > { %v2093_v18 = vadd.f32 %v1538_v45, %v550_v47 }
 0x189   : > { %v712_v46 = vpop.f32.mrf.mxu0 }
 0x18a   : > { %v765_v30 = vsub.f32 0.0, %v2093_v18  ;;  %v2104_v31 = vadd.f32 %v712_v46, %v540_v52 }
 0x18b   : > { %v1539_v49 = vpop.f32.mrf.mxu0 }
 0x18c   : > { %v2082_v7 = vadd.f32 %v1539_v49, %v555_v53  ;;  %v787_v40 = vmul.f32 1.442695, %v765_v30  ;;  %v781_v49 = vmul.f32 1.442695, %v762_v41 }
 0x18d   : > { %v715_v50 = vpop.f32.mrf.mxu0 }
 0x18e   : > { %v766_v24 = vsub.f32 0.0, %v2082_v7  ;;  %v2100_v25 = vadd.f32 %v715_v50, %v545_v61 }
 0x18f   : > { %v1542_v51 = vpop.f32.mrf.mxu0 }
 0x190   : > { %v2068_v56 = vadd.f32 %v1542_v51, %v570_v37  ;;  %v764_v37 = vsub.f32 0.0, %v2100_v25 }
 0x191   : > { %v728_v54 = vpop.f32.mrf.mxu0 }
 0x192   : > { %v769_v0 = vsub.f32 0.0, %v2068_v56  ;;  %v2076_v1 = vadd.f32 %v728_v54, %v560_v42  ;;  %v763_v42 = vsub.f32 0.0, %v2104_v31  ;;  %v785_v45 = vmul.f32 1.442695, %v764_v37 }
 0x193   : > { %v1543_v55 = vpop.f32.mrf.mxu0 }
 0x194   : > { %v2070_v57 = vadd.f32 %v1543_v55, %v575_v43  ;;  %v795_v11 = vmul.f32 1.442695, %v769_v0  ;;  %v767_v12 = vsub.f32 0.0, %v2076_v1  ;;  %v779_v43 = vmul.f32 1.442695, %v761_v32 }
 0x195   : > { %v731_v58 = vpop.f32.mrf.mxu0 }
 0x196   : > { %v2072_v60 = vadd.f32 %v731_v58, %v565_v48  ;;  %v770_v62 = vsub.f32 0.0, %v2070_v57  ;;  %v791_v27 = vmul.f32 1.442695, %v767_v12  ;;  %v783_v48 = vmul.f32 1.442695, %v763_v42 }
 0x197   : > { %v1546_v63 = vpop.f32.mrf.mxu0 }
 0x198   : > { %v2078_v2 = vadd.f32 %v1546_v63, %v590_v34  ;;  %v797_v4 = vmul.f32 1.442695, %v770_v62  ;;  %v768_v5 = vsub.f32 0.0, %v2072_v60 }
 0x199   : > { %v744_v3 = vpop.f32.mrf.mxu0 }
 0x19a   : > { %v773_v6 = vsub.f32 0.0, %v2078_v2  ;;  %v2084_v8 = vadd.f32 %v744_v3, %v580_v35  ;;  %1655 = vpow2.f32 %v797_v4  ;;  %v793_v21 = vmul.f32 1.442695, %v768_v5  ;;  %v525_v35 = vpop.permute.xlu1 %524  ;;  %v928_v5 = vpop.permute.xlu0 %927 }
 0x19b   : > { %v1547_v9 = vpop.f32.mrf.mxu0  ;;  %v2112_v39 = vadd.f32 %v2066_v44, %v525_v35 }
 0x19c   : > { %v803_v13 = vmul.f32 1.442695, %v773_v6  ;;  %v2087_v14 = vadd.f32 %v1547_v9, %v595_v36  ;;  %v771_v19 = vsub.f32 0.0, %v2084_v8  ;;  %v789_v36 = vmul.f32 1.442695, %v766_v24 }
 0x19d   : > { %v747_v20 = vpop.f32.mrf.mxu0  ;;  %v760_v47 = vsub.f32 0.0, %v2112_v39 }
 0x19e   : > { %v774_v22 = vsub.f32 0.0, %v2087_v14  ;;  %v2097_v23 = vadd.f32 %v747_v20, %v585_v38  ;;  %1657 = vpow2.f32 %v803_v13  ;;  %v799_v26 = vmul.f32 1.442695, %v771_v19  ;;  %v933_v62 = vpop.permute.xlu1 %932 }
 0x19f   : > { %1659 = vpow2.f32 %v795_v11  ;;  %v759_v38 = vsub.f32 0.0, %v2091_v17  ;;  %v777_v51 = vmul.f32 1.442695, %v760_v47 }
 0x1a0   : > { %v805_v28 = vmul.f32 1.442695, %v774_v22  ;;  %v772_v29 = vsub.f32 0.0, %v2097_v23  ;;  %1661 = vpow2.f32 %v799_v26 }
 0x1a1   : > { %1663 = vpow2.f32 %v793_v21  ;;  %v775_v46 = vmul.f32 1.442695, %v759_v38  ;;  %v918_v21 = vpop.permute.xlu0 %917 }
 0x1a2   : > { %v801_v34 = vmul.f32 1.442695, %v772_v29  ;;  %1665 = vpow2.f32 %v805_v28  ;;  %v923_v13 = vpop.permute.xlu1 %922 }
 0x1a3   : > { %1667 = vpow2.f32 %v791_v27 }
 0x1a4   : > { %1669 = vpow2.f32 %v801_v34 }
 0x1a5   : > { %1671 = vpow2.f32 %v789_v36  ;;  %v908_v36 = vpop.permute.xlu0 %907 }
 0x1a6   : > { %1673 = vpow2.f32 %v787_v40  ;;  %v913_v30 = vpop.permute.xlu1 %912 }
 0x1a7   : > { %1675 = vpow2.f32 %v779_v43  ;;  %v1656_v50 = vpop.eup %1655 }
 0x1a8   : > { %1677 = vpow2.f32 %v785_v45  ;;  %v818_v55 = vadd.f32 1.0, %v1656_v50 }
 0x1a9   : > { %1679 = vpow2.f32 %v775_v46 }
 0x1aa   : > { %1681 = vpow2.f32 %v783_v48  ;;  %v903_v48 = vpop.permute.xlu1 %902 }
 0x1ab   : > { %v1658_v44 = vpop.eup %1657  ;;  %1683 = vpow2.f32 %v781_v49 }
 0x1ac   : > { %v1660_v52 = vpop.eup %1659  ;;  %v821_v53 = vadd.f32 1.0, %v1658_v44 }
 0x1ad   : > { %v1662_v54 = vpop.eup %1661  ;;  %v817_v63 = vadd.f32 1.0, %v1660_v52 }
 0x1ae   : > { %v1664_v58 = vpop.eup %1663  ;;  %1685 = vrcp.f32 %v821_v53  ;;  %v819_v59 = vadd.f32 1.0, %v1662_v54 }
 0x1af   : > { %v1666_v61 = vpop.eup %1665  ;;  %1687 = vpow2.f32 %v777_v51  ;;  %v816_v6 = vadd.f32 1.0, %v1664_v58 }
 0x1b0   : > { %v1668_v0 = vpop.eup %1667  ;;  %1689 = vrcp.f32 %v819_v59  ;;  %v822_v3 = vadd.f32 1.0, %v1666_v61 }
 0x1b1   : > { %v1670_v4 = vpop.eup %1669  ;;  %1691 = vrcp.f32 %v818_v55  ;;  %v815_v11 = vadd.f32 1.0, %v1668_v0 }
 0x1b2   : > { %1693 = vrcp.f32 %v822_v3  ;;  %v820_v9 = vadd.f32 1.0, %v1670_v4  ;;  %v1672_v10 = vpop.eup %1671 }
 0x1b3   : > { %1695 = vrcp.f32 %v817_v63  ;;  %v1674_v12 = vpop.eup %1673  ;;  %v814_v19 = vadd.f32 1.0, %v1672_v10 }
 0x1b4   : > { %1697 = vrcp.f32 %v820_v9  ;;  %v1676_v15 = vpop.eup %1675  ;;  %v813_v24 = vadd.f32 1.0, %v1674_v12 }
 0x1b5   : > { %1699 = vrcp.f32 %v816_v6  ;;  %v1678_v20 = vpop.eup %1677  ;;  %v809_v43 = vadd.f32 1.0, %v1676_v15 }
 0x1b6   : > { %v1680_v22 = vpop.eup %1679  ;;  %1701 = vrcp.f32 %v815_v11  ;;  %v812_v28 = vadd.f32 1.0, %v1678_v20 }
 0x1b7   : > { %v1682_v26 = vpop.eup %1681  ;;  %1703 = vrcp.f32 %v814_v19  ;;  %v807_v54 = vadd.f32 1.0, %v1680_v22 }
 0x1b8   : > { %v1684_v27 = vpop.eup %1683  ;;  %1705 = vrcp.f32 %v813_v24  ;;  %v811_v34 = vadd.f32 1.0, %v1682_v26 }
 0x1b9   : > { %v810_v37 = vadd.f32 1.0, %v1684_v27  ;;  %1707 = vrcp.f32 %v812_v28 }
 0x1ba   : > { %1709 = vrcp.f32 %v811_v34 }
 0x1bb   : > { %v1686_v29 = vpop.eup %1685  ;;  %1711 = vrcp.f32 %v810_v37 }
 0x1bc   : > { %v1688_v32 = vpop.eup %1687  ;;  %v853_v40 = vmul.f32 %v1686_v29, %v2078_v2  ;;  %v898_v2 = vpop.permute.xlu0 %897  ;;  %1713 = vrcp.f32 %v809_v43 }
 0x1bd   : > { %v1690_v35 = vpop.eup %1689  ;;  %v808_v49 = vadd.f32 1.0, %v1688_v32 }
 0x1be   : > { %v1692_v38 = vpop.eup %1691  ;;  %v851_v45 = vmul.f32 %v1690_v35, %v2084_v8  ;;  %v949_v51 = vmul.f32 %v928_v5, %v853_v40 }
 0x1bf   : > { %v1694_v42 = vpop.eup %1693  ;;  %v850_v50 = vmul.f32 %v1692_v38, %v2070_v57  ;;  %1715 = vrcp.f32 %v808_v49  ;;  %v1646_v49 = vld [vmem:[%s2258_s6 + $0x38] sm:$0xff]  }
 0x1c0   : > { %v1696_v41 = vpop.eup %1695  ;;  %v854_v46 = vmul.f32 %v1694_v42, %v2087_v14  ;;  %v947_v58 = vmul.f32 %v918_v21, %v851_v45  ;;  %1717 = vrcp.f32 %v807_v54  ;;  %v1642_v45 = vld [vmem:[%s2258_s6 + $0x18] sm:$0xff]  }
 0x1c1   : > { %v1698_v47 = vpop.eup %1697  ;;  %v849_v55 = vmul.f32 %v1696_v41, %v2068_v56  ;;  %v946_v61 = vmul.f32 %v913_v30, %v850_v50  ;;  %v888_v56 = vpop.permute.xlu0 %887  ;;  %v1813_v50 = vmov 0.0  }
 0x1c2   : > { %v852_v44 = vmul.f32 %v1698_v47, %v2097_v23  ;;  %v950_v52 = vmul.f32 %v933_v62, %v854_v46  ;;  %v1700_v53 = vpop.eup %1699  ;;  %v893_v23 = vpop.permute.xlu1 %892  ;;  %v1643_v46 = vld [vmem:[%s2258_s6 + $0x20] sm:$0xff]   ;;  %v1644_v47 = vld [vmem:[%s2258_s6 + $0x28] sm:$0xff]   ;;  %1580 = vmatprep.subr.bf16.mxu0 %v1813_v50  ;;  %1596 = vmatprep.mubr.msk.bf16.mxu0 %vm1814_vm1, %v1813_v50 }
 0x1c3   : > { %v1702_v14 = vpop.eup %1701  ;;  %v848_v63 = vmul.f32 %v1700_v53, %v2072_v60  ;;  %v945_v62 = vmul.f32 %v908_v36, %v849_v55 }
 0x1c4   : > { %v948_v8 = vmul.f32 %v923_v13, %v852_v44  ;;  %v974_v59 = vpack.c.bf16 %v950_v52, %v949_v51  ;;  %v1704_v0 = vpop.eup %1703  ;;  %v847_v3 = vmul.f32 %v1702_v14, %v2076_v1 }
 0x1c5   : > { %v1706_v4 = vpop.eup %1705  ;;  %v846_v5 = vmul.f32 %v1704_v0, %v2082_v7  ;;  %v944_v6 = vmul.f32 %v903_v48, %v848_v63  ;;  %v972_v9 = vpack.c.bf16 %v946_v61, %v945_v62  ;;  %v878_v21 = vpop.permute.xlu0 %877  ;;  %v1645_v48 = vld [vmem:[%s2258_s6 + $0x30] sm:$0xff]  }
 0x1c6   : > { %1548 = vmatprep.subr.bf16.mxu1 %v974_v59  ;;  %v973_v57 = vpack.c.bf16 %v948_v8, %v947_v58  ;;  %v1708_v10 = vpop.eup %1707  ;;  %v845_v60 = vmul.f32 %v1706_v4, %v2093_v18  ;;  %v943_v11 = vmul.f32 %v898_v2, %v847_v3  ;;  %v883_v13 = vpop.permute.xlu1 %882 }
 0x1c7   : > { %1549 = vmatpush3.bf16.msra.mxu1 %v974_v59  ;;  %v1710_v12 = vpop.eup %1709  ;;  %v942_v19 = vmul.f32 %v893_v23, %v846_v5  ;;  %v844_v20 = vmul.f32 %v1708_v10, %v2100_v25 }
 0x1c8   : > { %1550 = vmatprep.subr.bf16.mxu1 %v973_v57  ;;  %v1712_v15 = vpop.eup %1711  ;;  %v971_v1 = vpack.c.bf16 %v944_v6, %v943_v11  ;;  %v941_v24 = vmul.f32 %v888_v56, %v845_v60  ;;  %v843_v7 = vmul.f32 %v1710_v12, %v2104_v31 }
 0x1c9   : > { %v1714_v22 = vpop.eup %1713  ;;  %v842_v26 = vmul.f32 %v1712_v15, %v2107_v33  ;;  %v940_v27 = vmul.f32 %v883_v13, %v844_v20  ;;  %v868_v34 = vpop.permute.xlu0 %867 }
 0x1ca   : > { %v970_v18 = vpack.c.bf16 %v942_v19, %v941_v24  ;;  %v873_v29 = vpop.permute.xlu1 %872  ;;  %v841_v30 = vmul.f32 %v1714_v22, %v2089_v16  ;;  %v939_v32 = vmul.f32 %v878_v21, %v843_v7 }
 0x1cb   : > { %1551 = vmatpush3.bf16.msra.mxu1 %v973_v57  ;;  %v938_v35 = vmul.f32 %v873_v29, %v842_v26 }
 0x1cc   : > { %1552 = vmatprep.subr.bf16.mxu1 %v972_v9  ;;  %v1716_v28 = vpop.eup %1715  ;;  %v969_v37 = vpack.c.bf16 %v940_v27, %v939_v32  ;;  %v937_v31 = vmul.f32 %v868_v34, %v841_v30 }
 0x1cd   : > { %v1718_v25 = vpop.eup %1717  ;;  %v840_v36 = vmul.f32 %v1716_v28, %v2112_v39  ;;  %v858_v43 = vpop.permute.xlu0 %857  ;;  %v1640_v39 = vld [vmem:[%s2258_s6 + $0x8] sm:$0xff]  }
 0x1ce   : > { %v839_v38 = vmul.f32 %v1718_v25, %v2091_v17  ;;  %v863_v33 = vpop.permute.xlu1 %862  ;;  %v968_v42 = vpack.c.bf16 %v938_v35, %v937_v31  ;;  %v1641_v17 = vld [vmem:[%s2258_s6 + $0x10] sm:$0xff]  }
 0x1cf   : > { %1553 = vmatpush3.bf16.msra.mxu1 %v972_v9  ;;  %v936_v40 = vmul.f32 %v863_v33, %v840_v36 }
 0x1d0   : > { %1554 = vmatprep.subr.bf16.mxu1 %v971_v1  ;;  %v935_v41 = vmul.f32 %v858_v43, %v839_v38 }
 0x1d1   : > { %v1064_v44 = vpop.permute.xlu0 %1063 }
 0x1d2   : > { %v967_v16 = vpack.c.bf16 %v936_v40, %v935_v41  ;;  %v1069_v51 = vpop.permute.xlu1 %1068 }
 0x1d3   : > { %1555 = vmatpush3.bf16.msra.mxu1 %v971_v1 }
 0x1d4   : > { %1556 = vmatprep.subr.bf16.mxu1 %v970_v18 }
 0x1d5   : > { %v1054_v2 = vpop.permute.xlu0 %1053 }
 0x1d6   : > { %v1059_v55 = vpop.permute.xlu1 %1058 }
 0x1d7   : > { %1557 = vmatpush3.bf16.msra.mxu1 %v970_v18 }
 0x1d8   : > { %1558 = vmatprep.subr.bf16.mxu1 %v969_v37 }
 0x1d9   : > { %v1044_v59 = vpop.permute.xlu0 %1043 }
 0x1da   : > { %v1049_v61 = vpop.permute.xlu1 %1048 }
 0x1db   : > { %1559 = vmatpush3.bf16.msra.mxu1 %v969_v37 }
 0x1dc   : > { %1560 = vmatprep.subr.bf16.mxu1 %v968_v42 }
 0x1dd   : > { %v1034_v0 = vpop.permute.xlu0 %1033 }
 0x1de   : > { %v1039_v62 = vpop.permute.xlu1 %1038 }
 0x1df   : > { %1561 = vmatpush3.bf16.msra.mxu1 %v968_v42 }
 0x1e0   : > { %1562 = vmatprep.subr.bf16.mxu1 %v967_v16 }
 0x1e1   : > { %v1024_v56 = vpop.permute.xlu0 %1023 }
 0x1e2   : > { %v1029_v9 = vpop.permute.xlu1 %1028 }
 0x1e3   : > { %1563 = vmatpush3.bf16.msra.mxu1 %v967_v16 }
 0x1e5   : > { %v1014_v19 = vpop.permute.xlu0 %1013 }
 0x1e6   : > { %1565 = vmatmul.mubr.bf16.vlgmr.msra.gmra.mxu1 %v1640_v39  ;;  %v1019_v26 = vpop.permute.xlu1 %1018 }
 0x1e7   : > { %1568 = vmatprep.mubr.bf16.mxu1 %v1641_v17 }
 0x1e9   : > { %v1004_v38 = vpop.permute.xlu0 %1003 }
 0x1ea   : > { %v1009_v41 = vpop.permute.xlu1 %1008 }
 0x1ee   : > { %1569 = vmatmul.mubr.bf16.gmra.mxu1 %v1642_v45 }
 0x1ef   : > { %1572 = vmatprep.mubr.bf16.mxu1 %v1643_v46 }
 0x1f6   : > { %1573 = vmatmul.mubr.bf16.gmra.mxu1 %v1644_v47 }
 0x1f7   : > { %1576 = vmatprep.mubr.bf16.mxu1 %v1645_v48 }
 0x1fe   : > { %1577 = vmatmul.mubr.bf16.gmra.mxu1 %v1646_v49 }
 0x2a6   : > { %v1566_v52 = vpop.f32.mrf.mxu1 }
 0x2a7   : > { %v2190_v42 = vadd.f32 %v1566_v52, %v1004_v38 }
 0x2a8   : > { %v2156_v53 = vpop.f32.mrf.mxu1 }
 0x2a9   : > { %v1218_v48 = vsub.f32 0.0, %v2190_v42 }
 0x2aa   : > { %v2158_v54 = vpop.f32.mrf.mxu1 }
 0x2ab   : > { %v2200_v49 = vadd.f32 %v2158_v54, %v1009_v41 }
 0x2ac   : > { %v2160_v58 = vpop.f32.mrf.mxu1 }
 0x2ae   : > { %v1570_v8 = vpop.f32.mrf.mxu1 }
 0x2af   : > { %v2187_v33 = vadd.f32 %v1570_v8, %v1024_v56  ;;  %v1236_v8 = vmul.f32 1.442695, %v1218_v48 }
 0x2b0   : > { %v1169_v14 = vpop.f32.mrf.mxu1 }
 0x2b1   : > { %v2195_v45 = vadd.f32 %v1169_v14, %v1014_v19  ;;  %v1222_v46 = vsub.f32 0.0, %v2187_v33 }
 0x2b2   : > { %v1571_v63 = vpop.f32.mrf.mxu1 }
 0x2b3   : > { %v2183_v25 = vadd.f32 %v1571_v63, %v1029_v9  ;;  %v1220_v52 = vsub.f32 0.0, %v2195_v45 }
 0x2b4   : > { %v1172_v57 = vpop.f32.mrf.mxu1 }
 0x2b5   : > { %v1223_v16 = vsub.f32 0.0, %v2183_v25  ;;  %v2193_v39 = vadd.f32 %v1172_v57, %v1019_v26 }
 0x2b6   : > { %v1574_v23 = vpop.f32.mrf.mxu1 }
 0x2b7   : > { %v2164_v60 = vadd.f32 %v1574_v23, %v1044_v59  ;;  %v1219_v59 = vsub.f32 0.0, %v2200_v49 }
 0x2b8   : > { %v1185_v3 = vpop.f32.mrf.mxu1 }
 0x2b9   : > { %v1226_v22 = vsub.f32 0.0, %v2164_v60  ;;  %v2177_v27 = vadd.f32 %v1185_v3, %v1034_v0  ;;  %v1240_v0 = vmul.f32 1.442695, %v1220_v52  ;;  %v1238_v3 = vmul.f32 1.442695, %v1219_v59 }
 0x2ba   : > { %v1575_v4 = vpop.f32.mrf.mxu1 }
 0x2bb   : > { %v2162_v6 = vadd.f32 %v1575_v4, %v1049_v61  ;;  %v1252_v36 = vmul.f32 1.442695, %v1226_v22  ;;  %v1224_v40 = vsub.f32 0.0, %v2177_v27  ;;  %v994_v61 = vpop.permute.xlu0 %993 }
 0x2bc   : > { %v1188_v5 = vpop.f32.mrf.mxu1  ;;  %v2209_v57 = vadd.f32 %v2156_v53, %v994_v61 }
 0x2bd   : > { %v1227_v13 = vsub.f32 0.0, %v2162_v6  ;;  %v2170_v20 = vadd.f32 %v1188_v5, %v1039_v62  ;;  %v1248_v47 = vmul.f32 1.442695, %v1224_v40 }
 0x2be   : > { %v1578_v10 = vpop.f32.mrf.mxu1 }
 0x2bf   : > { %v2166_v11 = vadd.f32 %v1578_v10, %v1064_v44  ;;  %v1254_v29 = vmul.f32 1.442695, %v1227_v13  ;;  %v1225_v34 = vsub.f32 0.0, %v2170_v20  ;;  %v1246_v44 = vmul.f32 1.442695, %v1223_v16 }
 0x2c0   : > { %v1201_v12 = vpop.f32.mrf.mxu1 }
 0x2c1   : > { %v1230_v15 = vsub.f32 0.0, %v2166_v11  ;;  %v2172_v1 = vadd.f32 %v1201_v12, %v1054_v2  ;;  %v1250_v17 = vmul.f32 1.442695, %v1225_v34  ;;  %v999_v2 = vpop.permute.xlu1 %998 }
 0x2c2   : > { %v1579_v21 = vpop.f32.mrf.mxu1  ;;  %v2206_v14 = vadd.f32 %v2160_v58, %v999_v2  ;;  %v1216_v58 = vsub.f32 0.0, %v2209_v57 }
 0x2c3   : > { %v1260_v24 = vmul.f32 1.442695, %v1230_v15  ;;  %v2175_v7 = vadd.f32 %v1579_v21, %v1069_v51  ;;  %v1228_v18 = vsub.f32 0.0, %v2172_v1  ;;  %v1221_v51 = vsub.f32 0.0, %v2193_v39 }
 0x2c4   : > { %v1204_v28 = vpop.f32.mrf.mxu1  ;;  %v1217_v4 = vsub.f32 0.0, %v2206_v14  ;;  %v1232_v22 = vmul.f32 1.442695, %v1216_v58 }
 0x2c5   : > { %v1231_v30 = vsub.f32 0.0, %v2175_v7  ;;  %v2181_v32 = vadd.f32 %v1204_v28, %v1059_v55  ;;  %1719 = vpow2.f32 %v1260_v24  ;;  %v1256_v35 = vmul.f32 1.442695, %v1228_v18 }
 0x2c6   : > { %v1244_v55 = vmul.f32 1.442695, %v1222_v46  ;;  %v1242_v63 = vmul.f32 1.442695, %v1221_v51  ;;  %v1234_v13 = vmul.f32 1.442695, %v1217_v4 }
 0x2c7   : > { %v1262_v37 = vmul.f32 1.442695, %v1231_v30  ;;  %v1229_v31 = vsub.f32 0.0, %v2181_v32  ;;  %1721 = vpow2.f32 %v1256_v35 }
 0x2c8   : > { %1723 = vpow2.f32 %v1254_v29 }
 0x2c9   : > { %v1258_v43 = vmul.f32 1.442695, %v1229_v31  ;;  %1725 = vpow2.f32 %v1262_v37 }
 0x2ca   : > { %1727 = vpow2.f32 %v1252_v36 }
 0x2cb   : > { %1729 = vpow2.f32 %v1258_v43 }
 0x2cc   : > { %1731 = vpow2.f32 %v1250_v17 }
 0x2cd   : > { %1733 = vpow2.f32 %v1248_v47 }
 0x2ce   : > { %1735 = vpow2.f32 %v1246_v44 }
 0x2cf   : > { %1737 = vpow2.f32 %v1244_v55 }
 0x2d0   : > { %1739 = vpow2.f32 %v1236_v8 }
 0x2d1   : > { %1741 = vpow2.f32 %v1242_v63 }
 0x2d2   : > { %v1720_v54 = vpop.eup %1719  ;;  %1743 = vpow2.f32 %v1240_v0 }
 0x2d3   : > { %v1278_v23 = vadd.f32 1.0, %v1720_v54 }
 0x2d4   : > { %v1722_v62 = vpop.eup %1721 }
 0x2d5   : > { %v1724_v56 = vpop.eup %1723  ;;  %v1276_v9 = vadd.f32 1.0, %v1722_v62  ;;  %1745 = vrcp.f32 %v1278_v23 }
 0x2d6   : > { %v1726_v5 = vpop.eup %1725  ;;  %1747 = vpow2.f32 %v1238_v3  ;;  %v1275_v15 = vadd.f32 1.0, %v1724_v56 }
 0x2d7   : > { %v1728_v10 = vpop.eup %1727  ;;  %v1279_v12 = vadd.f32 1.0, %v1726_v5 }
 0x2d8   : > { %v1730_v53 = vpop.eup %1729  ;;  %v1274_v24 = vadd.f32 1.0, %v1728_v10 }
 0x2d9   : > { %1749 = vrcp.f32 %v1279_v12  ;;  %v1277_v19 = vadd.f32 1.0, %v1730_v53  ;;  %v1732_v21 = vpop.eup %1731 }
 0x2da   : > { %1751 = vrcp.f32 %v1276_v9  ;;  %v1734_v26 = vpop.eup %1733  ;;  %v1273_v18 = vadd.f32 1.0, %v1732_v21 }
 0x2db   : > { %1753 = vrcp.f32 %v1277_v19  ;;  %v1736_v28 = vpop.eup %1735  ;;  %v1272_v29 = vadd.f32 1.0, %v1734_v26 }
 0x2dc   : > { %1755 = vpow2.f32 %v1234_v13  ;;  %v1738_v30 = vpop.eup %1737  ;;  %v1271_v35 = vadd.f32 1.0, %v1736_v28 }
 0x2dd   : > { %1757 = vrcp.f32 %v1275_v15  ;;  %v1740_v34 = vpop.eup %1739  ;;  %v1270_v31 = vadd.f32 1.0, %v1738_v30 }
 0x2de   : > { %1759 = vpow2.f32 %v1232_v22  ;;  %v1742_v36 = vpop.eup %1741  ;;  %v1266_v59 = vadd.f32 1.0, %v1740_v34 }
 0x2df   : > { %1761 = vrcp.f32 %v1274_v24  ;;  %v1744_v37 = vpop.eup %1743  ;;  %v1269_v43 = vadd.f32 1.0, %v1742_v36 }
 0x2e0   : > { %1763 = vrcp.f32 %v1273_v18  ;;  %v1268_v17 = vadd.f32 1.0, %v1744_v37 }
 0x2e1   : > { %1765 = vrcp.f32 %v1272_v29 }
 0x2e2   : > { %v1746_v38 = vpop.eup %1745  ;;  %1767 = vrcp.f32 %v1271_v35 }
 0x2e3   : > { %v1748_v40 = vpop.eup %1747  ;;  %1769 = vrcp.f32 %v1270_v31  ;;  %v1310_v46 = vmul.f32 %v1746_v38, %v2166_v11 }
 0x2e4   : > { %v1267_v51 = vadd.f32 1.0, %v1748_v40  ;;  %1771 = vrcp.f32 %v1269_v43 }
 0x2e5   : > { %1773 = vrcp.f32 %v1268_v17 }
 0x2e6   : > { %v1750_v41 = vpop.eup %1749  ;;  %1775 = vrcp.f32 %v1267_v51 }
 0x2e7   : > { %v1752_v16 = vpop.eup %1751  ;;  %v1311_v47 = vmul.f32 %v1750_v41, %v2175_v7  ;;  %1777 = vrcp.f32 %v1266_v59 }
 0x2e8   : > { %v1754_v48 = vpop.eup %1753  ;;  %v1308_v61 = vmul.f32 %v1752_v16, %v2172_v1 }
 0x2e9   : > { %v1756_v44 = vpop.eup %1755  ;;  %v1320_v52 = vpack.c.bf16 %v1311_v47, %v1310_v46  ;;  %v1309_v2 = vmul.f32 %v1754_v48, %v2181_v32 }
 0x2ea   : > { %v1758_v55 = vpop.eup %1757  ;;  %v1265_v11 = vadd.f32 1.0, %v1756_v44 }
 0x2eb   : > { %v1760_v8 = vpop.eup %1759  ;;  %1581 = vmatpush3.bf16.msra.mxu0 %v1320_v52  ;;  %v1307_v7 = vmul.f32 %v1758_v55, %v2162_v6  ;;  %v1319_v54 = vpack.c.bf16 %v1309_v2, %v1308_v61 }
 0x2ec   : > { %v1762_v63 = vpop.eup %1761  ;;  %1582 = vmatprep.subr.bf16.mxu0 %v1813_v50  ;;  %v1264_v23 = vadd.f32 1.0, %v1760_v8  ;;  %1779 = vrcp.f32 %v1265_v11 }
 0x2ed   : > { %v1764_v0 = vpop.eup %1763  ;;  %v1306_v32 = vmul.f32 %v1762_v63, %v2164_v60 }
 0x2ee   : > { %v1766_v62 = vpop.eup %1765  ;;  %v1305_v3 = vmul.f32 %v1764_v0, %v2170_v20  ;;  %1781 = vrcp.f32 %v1264_v23 }
 0x2ef   : > { %1583 = vmatpush3.bf16.msra.mxu0 %v1319_v54  ;;  %v1318_v1 = vpack.c.bf16 %v1307_v7, %v1306_v32  ;;  %v1768_v4 = vpop.eup %1767  ;;  %v1304_v56 = vmul.f32 %v1766_v62, %v2177_v27 }
 0x2f0   : > { %1584 = vmatprep.subr.bf16.mxu0 %v1813_v50  ;;  %v1770_v6 = vpop.eup %1769  ;;  %v1303_v5 = vmul.f32 %v1768_v4, %v2183_v25 }
 0x2f1   : > { %v1317_v58 = vpack.c.bf16 %v1305_v3, %v1304_v56  ;;  %v1772_v60 = vpop.eup %1771  ;;  %v1302_v9 = vmul.f32 %v1770_v6, %v2187_v33 }
 0x2f2   : > { %v1774_v10 = vpop.eup %1773  ;;  %v1301_v20 = vmul.f32 %v1772_v60, %v2193_v39 }
 0x2f3   : > { %1585 = vmatpush3.bf16.msra.mxu0 %v1318_v1  ;;  %v1316_v12 = vpack.c.bf16 %v1303_v5, %v1302_v9  ;;  %v1776_v53 = vpop.eup %1775  ;;  %v1300_v27 = vmul.f32 %v1774_v10, %v2195_v45 }
 0x2f4   : > { %1586 = vmatprep.subr.bf16.mxu0 %v1813_v50  ;;  %v1778_v13 = vpop.eup %1777  ;;  %v1299_v25 = vmul.f32 %v1776_v53, %v2200_v49  ;;  %v1312_v49 = vld [vmem:[%s2260_s8] sm:$0xf] }
 0x2f5   : > { %v1315_v15 = vpack.c.bf16 %v1301_v20, %v1300_v27  ;;  %v1298_v33 = vmul.f32 %v1778_v13, %v2190_v42  ;;  %v1325_v42 = vpop.permute.xlu0 %1324 }
 0x2f7   : > { %1587 = vmatpush3.bf16.msra.mxu0 %v1317_v58  ;;  %v1314_v22 = vpack.c.bf16 %v1299_v25, %v1298_v33 }
 0x2f8   : > { %1588 = vmatprep.subr.bf16.mxu0 %v1813_v50 }
 0x2f9   : > { %v1780_v19 = vpop.eup %1779 }
 0x2fa   : > { %v1297_v39 = vmul.f32 %v1780_v19, %v2206_v14 }
 0x2fb   : > { %1589 = vmatpush3.bf16.msra.mxu0 %v1316_v12  ;;  %v1782_v21 = vpop.eup %1781 }
 0x2fc   : > { %1590 = vmatprep.subr.bf16.mxu0 %v1813_v50  ;;  %v1296_v24 = vmul.f32 %v1782_v21, %v2209_v57 }
 0x2fe   : > { %v1313_v45 = vpack.c.bf16 %v1297_v39, %v1296_v24 }
 0x2ff   : > { %1591 = vmatpush3.bf16.msra.mxu0 %v1315_v15 }
 0x300   : > { %1592 = vmatprep.subr.bf16.mxu0 %v1813_v50 }
 0x303   : > { %1593 = vmatpush3.bf16.msra.mxu0 %v1314_v22 }
 0x304   : > { %1594 = vmatprep.subr.bf16.mxu0 %v1813_v50 }
 0x307   : > { %1595 = vmatpush3.bf16.msra.mxu0 %v1313_v45 }
 0x30a   : > { %1597 = vmatmul.mubr.bf16.vlgmr.msra.gmra.mxu0 %v1312_v49 }
 0x3ca   : > { %v1361_v26 = vpop.f32.mrf.mxu0 }
 0x3cb   : > { %v1362_v18 = vadd.f32 %v1361_v26, %v1325_v42 }
 0x3cc   : > { %v1598_v28 = vpop.f32.mrf.mxu0 }
 0x3cd   : > { %v1367_v29 = vsub.f32 0.0, %v1362_v18 }
 0x3ce   : > { %v1364_v30 = vpop.f32.mrf.mxu0 }
 0x3cf   : > { %v1368_v14 = vmul.f32 1.442695, %v1367_v29 }
 0x3d0   : > { %v1599_v34 = vpop.f32.mrf.mxu0 }
 0x3d1   : > { %1783 = vpow2.f32 %v1368_v14 }
 0x3de   : > { %v1784_v57 = vpop.eup %1783 }
 0x3df   : > { %v1370_v35 = vadd.f32 1.0, %v1784_v57 }
 0x3e1   : > { %1785 = vrcp.f32 %v1370_v35 }
 0x3ee   : > { %v1786_v50 = vpop.eup %1785 }
 0x3ef   : > { %v1372_v36 = vmul.f32 %v1786_v50, %v1362_v18 }
 0x3f1   : > { %1373 = vst [vmem:[%s405_s24] sm:$0xff] %v1372_v36 }
 0x3f2 PF: > { %s20_s15 = sadd.s32 1, %s1809_s15   ;;  %s2263_s13 = smov %s1805_s14 }
 0x3f3   : > { %p17_p5 = scmp.ge.s32.totalorder %s20_s15, 4   ;;  %s2264_s14 = smov %s2266_s16 }
 0x3f5   :  { %19 = sbr.rel (!%p17_p5) target bundleno = 2 (0x2), region = 93 }

</bundles_post_ra>
